<compile_context>
chip_gen: v5e
topology: v5e:2x2
jax: 0.10.0
libtpu: 0.0.40
codegen_flags: <defaults>
</compile_context>

<pallas_src>
import jax
import jax.numpy as jnp
from jax.experimental import pallas as pl
from jax.experimental.pallas import tpu as pltpu
import numpy as np

HIDDEN_SIZE = 10
INPUT_SIZE = 5
SEQ_LEN = 10
OUTPUT_SIZE = 1
GATE_PITCH = 128          # each of the 4 gates occupies its own 128-lane block
XPAD = 8                  # input dim padded to one sublane tile
HPAD = 16                 # hidden dim padded to two sublane tiles

# Parameter-slab row layout (lane width = 4 * GATE_PITCH = 512):
#   rows [0, XPAD)              : W_ih^T (rows >= INPUT_SIZE are zero)
#   rows [XPAD, XPAD+HPAD)      : W_hh^T (rows >= HIDDEN_SIZE are zero)
#   row  XPAD+HPAD              : b_ih + b_hh
#   row  XPAD+HPAD+1            : linear weight (lanes [0, HIDDEN_SIZE))
#   row  XPAD+HPAD+2            : linear bias   (lane 0)
SLAB_ROWS = XPAD + HPAD + 3
# Gate lane-block order inside the slab: i | f | o | g (sigmoid gates contiguous).


def lstm_kernel(x_ref, p_ref, out_ref):
    """Full LSTM sequence + final Linear in one kernel invocation.

    x_ref  : (T, XPAD)            input sequence, cols >= INPUT_SIZE are zero
    p_ref  : (SLAB_ROWS, 4*GP)    packed parameter slab (layout above)
    out_ref: (1, 1)               output = Linear(h_T)
    """
    GP = GATE_PITCH
    T = x_ref.shape[0]

    # Static slices of the single parameter slab (one DMA brought it all in).
    wih = p_ref[0:XPAD, :]                                     # (8, 512)
    whh = p_ref[XPAD:XPAD + HPAD, :]                           # (16, 512)
    bias = p_ref[XPAD + HPAD:XPAD + HPAD + 1, :]               # (1, 512)
    wlin_row = p_ref[XPAD + HPAD + 1:XPAD + HPAD + 2, 0:GP]    # (1, 128)
    blin = p_ref[XPAD + HPAD + 2:XPAD + HPAD + 3, 0:1]         # (1, 1)

    # (1) Hoisted input projection + bias for every timestep: one small matmul.
    #     Kept as a vreg value (no VMEM scratch round-trips).
    gx = (jnp.dot(x_ref[...], wih, preferred_element_type=jnp.float32)
          + bias)                                              # (T, 512)

    h = jnp.zeros((1, GP), jnp.float32)
    c = jnp.zeros((1, GP), jnp.float32)

    # Padded lanes (>= HIDDEN_SIZE) of every gate have zero weight and zero
    # bias, so with h = c = 0 they remain exactly zero through the recurrence:
    #   gates_pad = 0 -> i/f/o_pad = 0.5, g_pad = 0,
    #   c_pad -> 0.5*c_pad = 0, h_pad = 0.5*tanh(0) = 0.
    # Hence feeding h[:, :HPAD] against the zero-padded W_hh rows is exact.
    #
    # (2) Fully-unrolled static loop (T = 10): h/c live in vregs, W_hh is
    #     loop-invariant so its MXU weight push can be hoisted out of the loop.
    for t in range(T):
        gates = gx[t:t + 1, :] + jnp.dot(h[:, :HPAD], whh,
                                         preferred_element_type=jnp.float32)
        # One sigmoid over the contiguous i|f|o block, one tanh over g.
        sig = jax.nn.sigmoid(gates[:, 0:3 * GP])
        i_g = sig[:, 0 * GP:1 * GP]
        f_g = sig[:, 1 * GP:2 * GP]
        o_g = sig[:, 2 * GP:3 * GP]
        g_g = jnp.tanh(gates[:, 3 * GP:4 * GP])
        c = f_g * c + i_g * g_g
        h = o_g * jnp.tanh(c)

    # (3) Final Linear as a VPU multiply + lane reduce (no MXU tail); bias is
    #     folded into the single (1,1) output store.
    out_ref[...] = jnp.sum(h * wlin_row, axis=-1, keepdims=True) + blin


def prepare_params(w_ih, w_hh, b_ih, b_hh, w_lin, b_lin):
    """One-time (host-side) construction of the packed, lane-aligned slab."""
    GP = GATE_PITCH
    H = HIDDEN_SIZE
    D = INPUT_SIZE
    w_ih = np.asarray(w_ih, np.float32)
    w_hh = np.asarray(w_hh, np.float32)
    b_sum = np.asarray(b_ih, np.float32) + np.asarray(b_hh, np.float32)
    w_lin = np.asarray(w_lin, np.float32)
    b_lin = np.asarray(b_lin, np.float32)

    slab = np.zeros((SLAB_ROWS, 4 * GP), np.float32)
    # PyTorch gate row order is i, f, g, o; lane-block order is i, f, o, g.
    src_to_block = {0: 0, 1: 1, 2: 3, 3: 2}
    for src, blk in src_to_block.items():
        slab[0:D, blk * GP:blk * GP + H] = w_ih[src * H:(src + 1) * H, :].T
        slab[XPAD:XPAD + H, blk * GP:blk * GP + H] = w_hh[src * H:(src + 1) * H, :].T
        slab[XPAD + HPAD, blk * GP:blk * GP + H] = b_sum[src * H:(src + 1) * H]
    slab[XPAD + HPAD + 1, 0:H] = w_lin.reshape(-1)
    slab[XPAD + HPAD + 2, 0] = b_lin.reshape(-1)[0]
    return jnp.asarray(slab)


@jax.jit
def lstm_model_forward(x, params):
    """Jitted forward: pad x to 8 columns and run the single-shot kernel."""
    T, D = x.shape
    x_pad = jnp.pad(x.astype(jnp.float32), ((0, 0), (0, XPAD - D)))
    vmem = pl.BlockSpec(memory_space=pltpu.MemorySpace.VMEM)
    return pl.pallas_call(
        lstm_kernel,
        out_shape=jax.ShapeDtypeStruct((1, OUTPUT_SIZE), jnp.float32),
        in_specs=[vmem, vmem],
        out_specs=vmem,
    )(x_pad, params)


def lstm_model_reference(x, w_ih, w_hh, b_ih, b_hh, w_lin, b_lin):
    """Pure-JAX reference matching PyTorch nn.LSTM + nn.Linear semantics."""
    H = w_hh.shape[1]
    h = jnp.zeros((1, H), jnp.float32)
    c = jnp.zeros((1, H), jnp.float32)
    for t in range(x.shape[0]):
        x_t = x[t:t + 1, :]
        gates = x_t @ w_ih.T + h @ w_hh.T + b_ih + b_hh
        i_g = jax.nn.sigmoid(gates[:, 0 * H:1 * H])
        f_g = jax.nn.sigmoid(gates[:, 1 * H:2 * H])
        g_g = jnp.tanh(gates[:, 2 * H:3 * H])
        o_g = jax.nn.sigmoid(gates[:, 3 * H:4 * H])
        c = f_g * c + i_g * g_g
        h = o_g * jnp.tanh(c)
    return h @ w_lin.T + b_lin


if __name__ == "__main__":
    key = jax.random.PRNGKey(0)
    k = jax.random.split(key, 7)

    # Deterministic synthetic parameters (shapes follow nn.LSTM / nn.Linear).
    scale = 1.0 / np.sqrt(HIDDEN_SIZE)
    x = jax.random.normal(k[0], (SEQ_LEN, INPUT_SIZE), jnp.float32)
    w_ih = jax.random.uniform(k[1], (4 * HIDDEN_SIZE, INPUT_SIZE),
                              jnp.float32, -scale, scale)
    w_hh = jax.random.uniform(k[2], (4 * HIDDEN_SIZE, HIDDEN_SIZE),
                              jnp.float32, -scale, scale)
    b_ih = jax.random.uniform(k[3], (4 * HIDDEN_SIZE,),
                              jnp.float32, -scale, scale)
    b_hh = jax.random.uniform(k[4], (4 * HIDDEN_SIZE,),
                              jnp.float32, -scale, scale)
    w_lin = jax.random.uniform(k[5], (OUTPUT_SIZE, HIDDEN_SIZE),
                               jnp.float32, -scale, scale)
    b_lin = jax.random.uniform(k[6], (OUTPUT_SIZE,),
                               jnp.float32, -scale, scale)

    # Parameter packing happens once, outside the per-call path.
    params = prepare_params(w_ih, w_hh, b_ih, b_hh, w_lin, b_lin)

    out = lstm_model_forward(x, params)
    out = jax.block_until_ready(out)

    ref = lstm_model_reference(x, w_ih, w_hh, b_ih, b_hh, w_lin, b_lin)
    np.testing.assert_allclose(np.asarray(out), np.asarray(ref),
                               rtol=1e-4, atol=1e-5)
    assert out.shape == (1, OUTPUT_SIZE)
    print("KERNEL_OK")
</pallas_src>

<mosaic_0001>
module attributes {stable_mosaic.version = 11 : i64} {
  func.func @lstm_kernel(%arg0: memref<10x8xf32, #tpu.memory_space<vmem>>, %arg1: memref<27x512xf32, #tpu.memory_space<vmem>>, %arg2: memref<1x1xf32, #tpu.memory_space<vmem>>) attributes {dimension_semantics = [], scalar_prefetch = 0 : i64, scratch_operands = 0 : i64, tpu.core_type = #tpu.core_type<tc>} {
    %c0 = arith.constant 0 : index
    %c0_0 = arith.constant 0 : index
    %0 = vector.load %arg1[%c0, %c0_0] : memref<27x512xf32, #tpu.memory_space<vmem>>, vector<8x512xf32>
    %c8 = arith.constant 8 : index
    %c0_1 = arith.constant 0 : index
    %1 = vector.load %arg1[%c8, %c0_1] : memref<27x512xf32, #tpu.memory_space<vmem>>, vector<16x512xf32>
    %c24 = arith.constant 24 : index
    %c0_2 = arith.constant 0 : index
    %2 = vector.load %arg1[%c24, %c0_2] : memref<27x512xf32, #tpu.memory_space<vmem>>, vector<1x512xf32>
    %c25 = arith.constant 25 : index
    %c0_3 = arith.constant 0 : index
    %3 = vector.load %arg1[%c25, %c0_3] : memref<27x512xf32, #tpu.memory_space<vmem>>, vector<1x128xf32>
    %c26 = arith.constant 26 : index
    %c0_4 = arith.constant 0 : index
    %4 = vector.load %arg1[%c26, %c0_4] : memref<27x512xf32, #tpu.memory_space<vmem>>, vector<1x1xf32>
    %c0_5 = arith.constant 0 : index
    %c0_6 = arith.constant 0 : index
    %5 = vector.load %arg0[%c0_5, %c0_6] : memref<10x8xf32, #tpu.memory_space<vmem>>, vector<10x8xf32>
    %cst = arith.constant dense<0.000000e+00> : vector<10x512xf32>
    %6 = tpu.matmul %5, %0, %cst {dimension_numbers = #tpu.dot_dimension_numbers<[1], [0], [0], [1], [0, 0, 1, 1], [], []>} : vector<10x8xf32>, vector<8x512xf32>, vector<10x512xf32> -> vector<10x512xf32>
    %7 = vector.broadcast %2 : vector<1x512xf32> to vector<10x512xf32>
    %8 = arith.addf %6, %7 : vector<10x512xf32>
    %cst_7 = arith.constant 0.000000e+00 : f32
    %9 = vector.broadcast %cst_7 : f32 to vector<1x128xf32>
    %cst_8 = arith.constant 0.000000e+00 : f32
    %10 = vector.broadcast %cst_8 : f32 to vector<1x128xf32>
    %11 = vector.extract_strided_slice %8 {offsets = [0, 0], sizes = [1, 512], strides = [1, 1]} : vector<10x512xf32> to vector<1x512xf32>
    %12 = vector.extract_strided_slice %9 {offsets = [0, 0], sizes = [1, 16], strides = [1, 1]} : vector<1x128xf32> to vector<1x16xf32>
    %cst_9 = arith.constant dense<0.000000e+00> : vector<1x512xf32>
    %13 = tpu.matmul %12, %1, %cst_9 {dimension_numbers = #tpu.dot_dimension_numbers<[1], [0], [0], [1], [0, 0, 1, 1], [], []>} : vector<1x16xf32>, vector<16x512xf32>, vector<1x512xf32> -> vector<1x512xf32>
    %14 = arith.addf %11, %13 : vector<1x512xf32>
    %15 = vector.extract_strided_slice %14 {offsets = [0, 0], sizes = [1, 384], strides = [1, 1]} : vector<1x512xf32> to vector<1x384xf32>
    %16 = arith.negf %15 : vector<1x384xf32>
    %17 = math.exp %16 : vector<1x384xf32>
    %cst_10 = arith.constant 1.000000e+00 : f32
    %18 = vector.broadcast %cst_10 : f32 to vector<1x384xf32>
    %19 = arith.addf %18, %17 : vector<1x384xf32>
    %20 = arith.divf %18, %19 : vector<1x384xf32>
    %21 = vector.extract_strided_slice %20 {offsets = [0, 0], sizes = [1, 128], strides = [1, 1]} : vector<1x384xf32> to vector<1x128xf32>
    %22 = vector.extract_strided_slice %20 {offsets = [0, 128], sizes = [1, 128], strides = [1, 1]} : vector<1x384xf32> to vector<1x128xf32>
    %23 = vector.extract_strided_slice %20 {offsets = [0, 256], sizes = [1, 128], strides = [1, 1]} : vector<1x384xf32> to vector<1x128xf32>
    %24 = vector.extract_strided_slice %14 {offsets = [0, 384], sizes = [1, 128], strides = [1, 1]} : vector<1x512xf32> to vector<1x128xf32>
    %25 = math.tanh %24 : vector<1x128xf32>
    %26 = arith.mulf %22, %10 : vector<1x128xf32>
    %27 = arith.mulf %21, %25 : vector<1x128xf32>
    %28 = arith.addf %26, %27 : vector<1x128xf32>
    %29 = math.tanh %28 : vector<1x128xf32>
    %30 = arith.mulf %23, %29 : vector<1x128xf32>
    %31 = vector.extract_strided_slice %8 {offsets = [1, 0], sizes = [1, 512], strides = [1, 1]} : vector<10x512xf32> to vector<1x512xf32>
    %32 = vector.extract_strided_slice %30 {offsets = [0, 0], sizes = [1, 16], strides = [1, 1]} : vector<1x128xf32> to vector<1x16xf32>
    %cst_11 = arith.constant dense<0.000000e+00> : vector<1x512xf32>
    %33 = tpu.matmul %32, %1, %cst_11 {dimension_numbers = #tpu.dot_dimension_numbers<[1], [0], [0], [1], [0, 0, 1, 1], [], []>} : vector<1x16xf32>, vector<16x512xf32>, vector<1x512xf32> -> vector<1x512xf32>
    %34 = arith.addf %31, %33 : vector<1x512xf32>
    %35 = vector.extract_strided_slice %34 {offsets = [0, 0], sizes = [1, 384], strides = [1, 1]} : vector<1x512xf32> to vector<1x384xf32>
    %36 = arith.negf %35 : vector<1x384xf32>
    %37 = math.exp %36 : vector<1x384xf32>
    %cst_12 = arith.constant 1.000000e+00 : f32
    %38 = vector.broadcast %cst_12 : f32 to vector<1x384xf32>
    %39 = arith.addf %38, %37 : vector<1x384xf32>
    %40 = arith.divf %38, %39 : vector<1x384xf32>
    %41 = vector.extract_strided_slice %40 {offsets = [0, 0], sizes = [1, 128], strides = [1, 1]} : vector<1x384xf32> to vector<1x128xf32>
    %42 = vector.extract_strided_slice %40 {offsets = [0, 128], sizes = [1, 128], strides = [1, 1]} : vector<1x384xf32> to vector<1x128xf32>
    %43 = vector.extract_strided_slice %40 {offsets = [0, 256], sizes = [1, 128], strides = [1, 1]} : vector<1x384xf32> to vector<1x128xf32>
    %44 = vector.extract_strided_slice %34 {offsets = [0, 384], sizes = [1, 128], strides = [1, 1]} : vector<1x512xf32> to vector<1x128xf32>
    %45 = math.tanh %44 : vector<1x128xf32>
    %46 = arith.mulf %42, %28 : vector<1x128xf32>
    %47 = arith.mulf %41, %45 : vector<1x128xf32>
    %48 = arith.addf %46, %47 : vector<1x128xf32>
    %49 = math.tanh %48 : vector<1x128xf32>
    %50 = arith.mulf %43, %49 : vector<1x128xf32>
    %51 = vector.extract_strided_slice %8 {offsets = [2, 0], sizes = [1, 512], strides = [1, 1]} : vector<10x512xf32> to vector<1x512xf32>
    %52 = vector.extract_strided_slice %50 {offsets = [0, 0], sizes = [1, 16], strides = [1, 1]} : vector<1x128xf32> to vector<1x16xf32>
    %cst_13 = arith.constant dense<0.000000e+00> : vector<1x512xf32>
    %53 = tpu.matmul %52, %1, %cst_13 {dimension_numbers = #tpu.dot_dimension_numbers<[1], [0], [0], [1], [0, 0, 1, 1], [], []>} : vector<1x16xf32>, vector<16x512xf32>, vector<1x512xf32> -> vector<1x512xf32>
    %54 = arith.addf %51, %53 : vector<1x512xf32>
    %55 = vector.extract_strided_slice %54 {offsets = [0, 0], sizes = [1, 384], strides = [1, 1]} : vector<1x512xf32> to vector<1x384xf32>
    %56 = arith.negf %55 : vector<1x384xf32>
    %57 = math.exp %56 : vector<1x384xf32>
    %cst_14 = arith.constant 1.000000e+00 : f32
    %58 = vector.broadcast %cst_14 : f32 to vector<1x384xf32>
    %59 = arith.addf %58, %57 : vector<1x384xf32>
    %60 = arith.divf %58, %59 : vector<1x384xf32>
    %61 = vector.extract_strided_slice %60 {offsets = [0, 0], sizes = [1, 128], strides = [1, 1]} : vector<1x384xf32> to vector<1x128xf32>
    %62 = vector.extract_strided_slice %60 {offsets = [0, 128], sizes = [1, 128], strides = [1, 1]} : vector<1x384xf32> to vector<1x128xf32>
    %63 = vector.extract_strided_slice %60 {offsets = [0, 256], sizes = [1, 128], strides = [1, 1]} : vector<1x384xf32> to vector<1x128xf32>
    %64 = vector.extract_strided_slice %54 {offsets = [0, 384], sizes = [1, 128], strides = [1, 1]} : vector<1x512xf32> to vector<1x128xf32>
    %65 = math.tanh %64 : vector<1x128xf32>
    %66 = arith.mulf %62, %48 : vector<1x128xf32>
    %67 = arith.mulf %61, %65 : vector<1x128xf32>
    %68 = arith.addf %66, %67 : vector<1x128xf32>
    %69 = math.tanh %68 : vector<1x128xf32>
    %70 = arith.mulf %63, %69 : vector<1x128xf32>
    %71 = vector.extract_strided_slice %8 {offsets = [3, 0], sizes = [1, 512], strides = [1, 1]} : vector<10x512xf32> to vector<1x512xf32>
    %72 = vector.extract_strided_slice %70 {offsets = [0, 0], sizes = [1, 16], strides = [1, 1]} : vector<1x128xf32> to vector<1x16xf32>
    %cst_15 = arith.constant dense<0.000000e+00> : vector<1x512xf32>
    %73 = tpu.matmul %72, %1, %cst_15 {dimension_numbers = #tpu.dot_dimension_numbers<[1], [0], [0], [1], [0, 0, 1, 1], [], []>} : vector<1x16xf32>, vector<16x512xf32>, vector<1x512xf32> -> vector<1x512xf32>
    %74 = arith.addf %71, %73 : vector<1x512xf32>
    %75 = vector.extract_strided_slice %74 {offsets = [0, 0], sizes = [1, 384], strides = [1, 1]} : vector<1x512xf32> to vector<1x384xf32>
    %76 = arith.negf %75 : vector<1x384xf32>
    %77 = math.exp %76 : vector<1x384xf32>
    %cst_16 = arith.constant 1.000000e+00 : f32
    %78 = vector.broadcast %cst_16 : f32 to vector<1x384xf32>
    %79 = arith.addf %78, %77 : vector<1x384xf32>
    %80 = arith.divf %78, %79 : vector<1x384xf32>
    %81 = vector.extract_strided_slice %80 {offsets = [0, 0], sizes = [1, 128], strides = [1, 1]} : vector<1x384xf32> to vector<1x128xf32>
    %82 = vector.extract_strided_slice %80 {offsets = [0, 128], sizes = [1, 128], strides = [1, 1]} : vector<1x384xf32> to vector<1x128xf32>
    %83 = vector.extract_strided_slice %80 {offsets = [0, 256], sizes = [1, 128], strides = [1, 1]} : vector<1x384xf32> to vector<1x128xf32>
    %84 = vector.extract_strided_slice %74 {offsets = [0, 384], sizes = [1, 128], strides = [1, 1]} : vector<1x512xf32> to vector<1x128xf32>
    %85 = math.tanh %84 : vector<1x128xf32>
    %86 = arith.mulf %82, %68 : vector<1x128xf32>
    %87 = arith.mulf %81, %85 : vector<1x128xf32>
    %88 = arith.addf %86, %87 : vector<1x128xf32>
    %89 = math.tanh %88 : vector<1x128xf32>
    %90 = arith.mulf %83, %89 : vector<1x128xf32>
    %91 = vector.extract_strided_slice %8 {offsets = [4, 0], sizes = [1, 512], strides = [1, 1]} : vector<10x512xf32> to vector<1x512xf32>
    %92 = vector.extract_strided_slice %90 {offsets = [0, 0], sizes = [1, 16], strides = [1, 1]} : vector<1x128xf32> to vector<1x16xf32>
    %cst_17 = arith.constant dense<0.000000e+00> : vector<1x512xf32>
    %93 = tpu.matmul %92, %1, %cst_17 {dimension_numbers = #tpu.dot_dimension_numbers<[1], [0], [0], [1], [0, 0, 1, 1], [], []>} : vector<1x16xf32>, vector<16x512xf32>, vector<1x512xf32> -> vector<1x512xf32>
    %94 = arith.addf %91, %93 : vector<1x512xf32>
    %95 = vector.extract_strided_slice %94 {offsets = [0, 0], sizes = [1, 384], strides = [1, 1]} : vector<1x512xf32> to vector<1x384xf32>
    %96 = arith.negf %95 : vector<1x384xf32>
    %97 = math.exp %96 : vector<1x384xf32>
    %cst_18 = arith.constant 1.000000e+00 : f32
    %98 = vector.broadcast %cst_18 : f32 to vector<1x384xf32>
    %99 = arith.addf %98, %97 : vector<1x384xf32>
    %100 = arith.divf %98, %99 : vector<1x384xf32>
    %101 = vector.extract_strided_slice %100 {offsets = [0, 0], sizes = [1, 128], strides = [1, 1]} : vector<1x384xf32> to vector<1x128xf32>
    %102 = vector.extract_strided_slice %100 {offsets = [0, 128], sizes = [1, 128], strides = [1, 1]} : vector<1x384xf32> to vector<1x128xf32>
    %103 = vector.extract_strided_slice %100 {offsets = [0, 256], sizes = [1, 128], strides = [1, 1]} : vector<1x384xf32> to vector<1x128xf32>
    %104 = vector.extract_strided_slice %94 {offsets = [0, 384], sizes = [1, 128], strides = [1, 1]} : vector<1x512xf32> to vector<1x128xf32>
    %105 = math.tanh %104 : vector<1x128xf32>
    %106 = arith.mulf %102, %88 : vector<1x128xf32>
    %107 = arith.mulf %101, %105 : vector<1x128xf32>
    %108 = arith.addf %106, %107 : vector<1x128xf32>
    %109 = math.tanh %108 : vector<1x128xf32>
    %110 = arith.mulf %103, %109 : vector<1x128xf32>
    %111 = vector.extract_strided_slice %8 {offsets = [5, 0], sizes = [1, 512], strides = [1, 1]} : vector<10x512xf32> to vector<1x512xf32>
    %112 = vector.extract_strided_slice %110 {offsets = [0, 0], sizes = [1, 16], strides = [1, 1]} : vector<1x128xf32> to vector<1x16xf32>
    %cst_19 = arith.constant dense<0.000000e+00> : vector<1x512xf32>
    %113 = tpu.matmul %112, %1, %cst_19 {dimension_numbers = #tpu.dot_dimension_numbers<[1], [0], [0], [1], [0, 0, 1, 1], [], []>} : vector<1x16xf32>, vector<16x512xf32>, vector<1x512xf32> -> vector<1x512xf32>
    %114 = arith.addf %111, %113 : vector<1x512xf32>
    %115 = vector.extract_strided_slice %114 {offsets = [0, 0], sizes = [1, 384], strides = [1, 1]} : vector<1x512xf32> to vector<1x384xf32>
    %116 = arith.negf %115 : vector<1x384xf32>
    %117 = math.exp %116 : vector<1x384xf32>
    %cst_20 = arith.constant 1.000000e+00 : f32
    %118 = vector.broadcast %cst_20 : f32 to vector<1x384xf32>
    %119 = arith.addf %118, %117 : vector<1x384xf32>
    %120 = arith.divf %118, %119 : vector<1x384xf32>
    %121 = vector.extract_strided_slice %120 {offsets = [0, 0], sizes = [1, 128], strides = [1, 1]} : vector<1x384xf32> to vector<1x128xf32>
    %122 = vector.extract_strided_slice %120 {offsets = [0, 128], sizes = [1, 128], strides = [1, 1]} : vector<1x384xf32> to vector<1x128xf32>
    %123 = vector.extract_strided_slice %120 {offsets = [0, 256], sizes = [1, 128], strides = [1, 1]} : vector<1x384xf32> to vector<1x128xf32>
    %124 = vector.extract_strided_slice %114 {offsets = [0, 384], sizes = [1, 128], strides = [1, 1]} : vector<1x512xf32> to vector<1x128xf32>
    %125 = math.tanh %124 : vector<1x128xf32>
    %126 = arith.mulf %122, %108 : vector<1x128xf32>
    %127 = arith.mulf %121, %125 : vector<1x128xf32>
    %128 = arith.addf %126, %127 : vector<1x128xf32>
    %129 = math.tanh %128 : vector<1x128xf32>
    %130 = arith.mulf %123, %129 : vector<1x128xf32>
    %131 = vector.extract_strided_slice %8 {offsets = [6, 0], sizes = [1, 512], strides = [1, 1]} : vector<10x512xf32> to vector<1x512xf32>
    %132 = vector.extract_strided_slice %130 {offsets = [0, 0], sizes = [1, 16], strides = [1, 1]} : vector<1x128xf32> to vector<1x16xf32>
    %cst_21 = arith.constant dense<0.000000e+00> : vector<1x512xf32>
    %133 = tpu.matmul %132, %1, %cst_21 {dimension_numbers = #tpu.dot_dimension_numbers<[1], [0], [0], [1], [0, 0, 1, 1], [], []>} : vector<1x16xf32>, vector<16x512xf32>, vector<1x512xf32> -> vector<1x512xf32>
    %134 = arith.addf %131, %133 : vector<1x512xf32>
    %135 = vector.extract_strided_slice %134 {offsets = [0, 0], sizes = [1, 384], strides = [1, 1]} : vector<1x512xf32> to vector<1x384xf32>
    %136 = arith.negf %135 : vector<1x384xf32>
    %137 = math.exp %136 : vector<1x384xf32>
    %cst_22 = arith.constant 1.000000e+00 : f32
    %138 = vector.broadcast %cst_22 : f32 to vector<1x384xf32>
    %139 = arith.addf %138, %137 : vector<1x384xf32>
    %140 = arith.divf %138, %139 : vector<1x384xf32>
    %141 = vector.extract_strided_slice %140 {offsets = [0, 0], sizes = [1, 128], strides = [1, 1]} : vector<1x384xf32> to vector<1x128xf32>
    %142 = vector.extract_strided_slice %140 {offsets = [0, 128], sizes = [1, 128], strides = [1, 1]} : vector<1x384xf32> to vector<1x128xf32>
    %143 = vector.extract_strided_slice %140 {offsets = [0, 256], sizes = [1, 128], strides = [1, 1]} : vector<1x384xf32> to vector<1x128xf32>
    %144 = vector.extract_strided_slice %134 {offsets = [0, 384], sizes = [1, 128], strides = [1, 1]} : vector<1x512xf32> to vector<1x128xf32>
    %145 = math.tanh %144 : vector<1x128xf32>
    %146 = arith.mulf %142, %128 : vector<1x128xf32>
    %147 = arith.mulf %141, %145 : vector<1x128xf32>
    %148 = arith.addf %146, %147 : vector<1x128xf32>
    %149 = math.tanh %148 : vector<1x128xf32>
    %150 = arith.mulf %143, %149 : vector<1x128xf32>
    %151 = vector.extract_strided_slice %8 {offsets = [7, 0], sizes = [1, 512], strides = [1, 1]} : vector<10x512xf32> to vector<1x512xf32>
    %152 = vector.extract_strided_slice %150 {offsets = [0, 0], sizes = [1, 16], strides = [1, 1]} : vector<1x128xf32> to vector<1x16xf32>
    %cst_23 = arith.constant dense<0.000000e+00> : vector<1x512xf32>
    %153 = tpu.matmul %152, %1, %cst_23 {dimension_numbers = #tpu.dot_dimension_numbers<[1], [0], [0], [1], [0, 0, 1, 1], [], []>} : vector<1x16xf32>, vector<16x512xf32>, vector<1x512xf32> -> vector<1x512xf32>
    %154 = arith.addf %151, %153 : vector<1x512xf32>
    %155 = vector.extract_strided_slice %154 {offsets = [0, 0], sizes = [1, 384], strides = [1, 1]} : vector<1x512xf32> to vector<1x384xf32>
    %156 = arith.negf %155 : vector<1x384xf32>
    %157 = math.exp %156 : vector<1x384xf32>
    %cst_24 = arith.constant 1.000000e+00 : f32
    %158 = vector.broadcast %cst_24 : f32 to vector<1x384xf32>
    %159 = arith.addf %158, %157 : vector<1x384xf32>
    %160 = arith.divf %158, %159 : vector<1x384xf32>
    %161 = vector.extract_strided_slice %160 {offsets = [0, 0], sizes = [1, 128], strides = [1, 1]} : vector<1x384xf32> to vector<1x128xf32>
    %162 = vector.extract_strided_slice %160 {offsets = [0, 128], sizes = [1, 128], strides = [1, 1]} : vector<1x384xf32> to vector<1x128xf32>
    %163 = vector.extract_strided_slice %160 {offsets = [0, 256], sizes = [1, 128], strides = [1, 1]} : vector<1x384xf32> to vector<1x128xf32>
    %164 = vector.extract_strided_slice %154 {offsets = [0, 384], sizes = [1, 128], strides = [1, 1]} : vector<1x512xf32> to vector<1x128xf32>
    %165 = math.tanh %164 : vector<1x128xf32>
    %166 = arith.mulf %162, %148 : vector<1x128xf32>
    %167 = arith.mulf %161, %165 : vector<1x128xf32>
    %168 = arith.addf %166, %167 : vector<1x128xf32>
    %169 = math.tanh %168 : vector<1x128xf32>
    %170 = arith.mulf %163, %169 : vector<1x128xf32>
    %171 = vector.extract_strided_slice %8 {offsets = [8, 0], sizes = [1, 512], strides = [1, 1]} : vector<10x512xf32> to vector<1x512xf32>
    %172 = vector.extract_strided_slice %170 {offsets = [0, 0], sizes = [1, 16], strides = [1, 1]} : vector<1x128xf32> to vector<1x16xf32>
    %cst_25 = arith.constant dense<0.000000e+00> : vector<1x512xf32>
    %173 = tpu.matmul %172, %1, %cst_25 {dimension_numbers = #tpu.dot_dimension_numbers<[1], [0], [0], [1], [0, 0, 1, 1], [], []>} : vector<1x16xf32>, vector<16x512xf32>, vector<1x512xf32> -> vector<1x512xf32>
    %174 = arith.addf %171, %173 : vector<1x512xf32>
    %175 = vector.extract_strided_slice %174 {offsets = [0, 0], sizes = [1, 384], strides = [1, 1]} : vector<1x512xf32> to vector<1x384xf32>
    %176 = arith.negf %175 : vector<1x384xf32>
    %177 = math.exp %176 : vector<1x384xf32>
    %cst_26 = arith.constant 1.000000e+00 : f32
    %178 = vector.broadcast %cst_26 : f32 to vector<1x384xf32>
    %179 = arith.addf %178, %177 : vector<1x384xf32>
    %180 = arith.divf %178, %179 : vector<1x384xf32>
    %181 = vector.extract_strided_slice %180 {offsets = [0, 0], sizes = [1, 128], strides = [1, 1]} : vector<1x384xf32> to vector<1x128xf32>
    %182 = vector.extract_strided_slice %180 {offsets = [0, 128], sizes = [1, 128], strides = [1, 1]} : vector<1x384xf32> to vector<1x128xf32>
    %183 = vector.extract_strided_slice %180 {offsets = [0, 256], sizes = [1, 128], strides = [1, 1]} : vector<1x384xf32> to vector<1x128xf32>
    %184 = vector.extract_strided_slice %174 {offsets = [0, 384], sizes = [1, 128], strides = [1, 1]} : vector<1x512xf32> to vector<1x128xf32>
    %185 = math.tanh %184 : vector<1x128xf32>
    %186 = arith.mulf %182, %168 : vector<1x128xf32>
    %187 = arith.mulf %181, %185 : vector<1x128xf32>
    %188 = arith.addf %186, %187 : vector<1x128xf32>
    %189 = math.tanh %188 : vector<1x128xf32>
    %190 = arith.mulf %183, %189 : vector<1x128xf32>
    %191 = vector.extract_strided_slice %8 {offsets = [9, 0], sizes = [1, 512], strides = [1, 1]} : vector<10x512xf32> to vector<1x512xf32>
    %192 = vector.extract_strided_slice %190 {offsets = [0, 0], sizes = [1, 16], strides = [1, 1]} : vector<1x128xf32> to vector<1x16xf32>
    %cst_27 = arith.constant dense<0.000000e+00> : vector<1x512xf32>
    %193 = tpu.matmul %192, %1, %cst_27 {dimension_numbers = #tpu.dot_dimension_numbers<[1], [0], [0], [1], [0, 0, 1, 1], [], []>} : vector<1x16xf32>, vector<16x512xf32>, vector<1x512xf32> -> vector<1x512xf32>
    %194 = arith.addf %191, %193 : vector<1x512xf32>
    %195 = vector.extract_strided_slice %194 {offsets = [0, 0], sizes = [1, 384], strides = [1, 1]} : vector<1x512xf32> to vector<1x384xf32>
    %196 = arith.negf %195 : vector<1x384xf32>
    %197 = math.exp %196 : vector<1x384xf32>
    %cst_28 = arith.constant 1.000000e+00 : f32
    %198 = vector.broadcast %cst_28 : f32 to vector<1x384xf32>
    %199 = arith.addf %198, %197 : vector<1x384xf32>
    %200 = arith.divf %198, %199 : vector<1x384xf32>
    %201 = vector.extract_strided_slice %200 {offsets = [0, 0], sizes = [1, 128], strides = [1, 1]} : vector<1x384xf32> to vector<1x128xf32>
    %202 = vector.extract_strided_slice %200 {offsets = [0, 128], sizes = [1, 128], strides = [1, 1]} : vector<1x384xf32> to vector<1x128xf32>
    %203 = vector.extract_strided_slice %200 {offsets = [0, 256], sizes = [1, 128], strides = [1, 1]} : vector<1x384xf32> to vector<1x128xf32>
    %204 = vector.extract_strided_slice %194 {offsets = [0, 384], sizes = [1, 128], strides = [1, 1]} : vector<1x512xf32> to vector<1x128xf32>
    %205 = math.tanh %204 : vector<1x128xf32>
    %206 = arith.mulf %202, %188 : vector<1x128xf32>
    %207 = arith.mulf %201, %205 : vector<1x128xf32>
    %208 = arith.addf %206, %207 : vector<1x128xf32>
    %209 = math.tanh %208 : vector<1x128xf32>
    %210 = arith.mulf %203, %209 : vector<1x128xf32>
    %211 = arith.mulf %210, %3 : vector<1x128xf32>
    %cst_29 = arith.constant dense<0.000000e+00> : vector<1xf32>
    %212 = vector.multi_reduction <add>, %211, %cst_29 [1] : vector<1x128xf32> to vector<1xf32>
    %213 = vector.shape_cast %212 : vector<1xf32> to vector<1x1xf32>
    %214 = arith.addf %213, %4 : vector<1x1xf32>
    %c0_30 = arith.constant 0 : index
    %c0_31 = arith.constant 0 : index
    %215 = vector.load %arg2[%c0_30, %c0_31] : memref<1x1xf32, #tpu.memory_space<vmem>>, vector<1x1xf32>
    tpu.vector_store %arg2[%c0_30, %c0_31], %214 {strides = array<i32>} : memref<1x1xf32, #tpu.memory_space<vmem>>, vector<1x1xf32>,
    return
  }
}

</mosaic_0001>

<bundles_post_ra>
// kernel: lstm_model_forward.1
= control target key start
LH: loop header
LB: loop body
LE: loop exit
PB: predicated region body
PF: predicated region fallthrough
CT: control target
= control target key end

     0   :  { %7 = vsyncpa [#allocation3], 0  ;;  %s2389_s0 = inlined_call_operand.vmem [shape: f32[10,8], index: 0, kind: input, shape index: {}]   ;;  %s2390_s1 = inlined_call_operand.hbm [shape: f32[27,512], index: 1, kind: input, shape index: {}]   ;;  %s2391_s2 = inlined_call_operand.hbm [shape: f32[1,1], index: 2, kind: output, shape index: {}]  }
   0x1   :  { %8 = vsyncpa [#allocation4], 0  ;;  %s15_s11 = sshll.u32 %s2390_s1, 4  ;;  %s2109_s12 = smov [#allocation2]   ;;  %s16_s11 = int_to_ptr.hbm [resolvable:$true] %s15_s11 }
   0x2   :  { %s17_s13 = sshll.u32 %s2109_s12, 4  ;;  %s2110_s14 = smov 512   ;;  %s18_s13 = int_to_ptr.vmem [resolvable:$true] %s17_s13 }
   0x3   :  { %s2111_s15 = smov 32  }
   0x4   :  { %23 = dma.hbm_to_vmem [thread:$0]  %s16_s11, 2048, %s18_s13, [#allocation3], %s2110_s14, %s2110_s14, %s2111_s15  }
   0x5   :  { %2105 = dma.done.wait [#allocation3], 2048  }
   0x6   :  { %2106 = vsyncadd [#allocation3], 4294965248  ;;  %vm55_vm0 = vcmask 64512   ;;  %v28_v0 = vld [vmem:[#allocation2] sm:$0xff]  ;;  %v29_v1 = vld [vmem:[#allocation2 + $0x8] sm:$0xff]  ;;  %v2112_v14 = vmov 0.0  }
   0x7   :  { %v30_v2 = vld [vmem:[#allocation2 + $0x10] sm:$0xff]  ;;  %77 = vmatpush.msra.mxu0 %v28_v0  ;;  %100 = vmatpush.msra.mxu1 %v29_v1  ;;  %v44_v3 = vld [vmem:[%s2389_s0] sm:$0xff]  ;;  %v31_v4 = vld [vmem:[#allocation2 + $0x18] sm:$0xff]  ;;  %vm154_vm13 = vcmask 130048   ;;  %s1800_s22 = sshll.u32 %s2391_s2, 4  ;;  %s1801_s22 = int_to_ptr.hbm [resolvable:$true] %s1800_s22 }
   0x8   :  { %v2135_v5 = vld [vmem:[#allocation2 + $0x40] sm:$0xff]  ;;  %123 = vmatpush.msra.mxu2 %v30_v2  ;;  %1810 = vmatmul.msk.f32.vlgmr.msra.gmra.mxu0 %vm55_vm0, %v44_v3  ;;  %v2138_v6 = vld [vmem:[#allocation2 + $0x48] sm:$0xff]  ;;  %v2142_v7 = vld [vmem:[#allocation2 + $0x50] sm:$0xff] }
   0x9   :  { %1812 = vmatmul.msk.f32.vlgmr.msra.gmra.mxu1 %vm55_vm0, %v44_v3  ;;  %1814 = vmatmul.msk.f32.vlgmr.msra.gmra.mxu2 %vm55_vm0, %v44_v3  ;;  %v2144_v8 = vld [vmem:[#allocation2 + $0x20] sm:$0xff]  ;;  %v2147_v9 = vld [vmem:[#allocation2 + $0x28] sm:$0xff]  ;;  %v2149_v10 = vld [vmem:[#allocation2 + $0x58] sm:$0xff] }
   0xa   :  { %146 = vmatpush.msra.mxu3 %v31_v4  ;;  %172 = vmatpush.msrb.mxu0 %v2135_v5  ;;  %v2153_v11 = vld [vmem:[#allocation2 + $0x30] sm:$0xff]  ;;  %v2157_v12 = vld [vmem:[#allocation2 + $0x38] sm:$0xff]  ;;  %v45_v13 = vld [vmem:[%s2389_s0 + $0x8] sm:$0x3]  ;;  %s2113_s0 = smov [#allocation5]  }
   0xb   :  { %192 = vmatpush.msrb.mxu1 %v2138_v6  ;;  %1816 = vmatmul.msk.f32.vlgmr.msra.gmra.mxu3 %vm55_vm0, %v44_v3  ;;  %v41_v17 = vld [vmem:[#allocation2 + $0x60] ss:$8 sm:$0xf]  ;;  %s1798_s19 = sshll.u32 %s2113_s0, 4  ;;  %s1799_s19 = int_to_ptr.vmem [resolvable:$true] %s1798_s19 }
   0xc   :  { %212 = vmatpush.msrb.mxu2 %v2142_v7  ;;  %173 = vmatpush.msrb.mxu0 %v2144_v8  ;;  %v47_v18 = vperm.slane %v41_v17, 0  ;;  %v48_v20 = vperm.slane %v41_v17, 1  ;;  %v49_v26 = vperm.slane %v41_v17, 2  ;;  %v50_v30 = vperm.slane %v41_v17, 3 }
   0xd   :  { %193 = vmatpush.msrb.mxu1 %v2147_v9  ;;  %232 = vmatpush.msrb.mxu3 %v2149_v10 }
   0xe   :  { %213 = vmatpush.msrb.mxu2 %v2153_v11  ;;  %322 = vmatpush.msra.mxu0 %v2135_v5 }
   0xf   :  { %233 = vmatpush.msrb.mxu3 %v2157_v12  ;;  %342 = vmatpush.msra.mxu1 %v2138_v6 }
  0x10   :  { %1811 = vmatmul.msk.f32.gmra.mxu0 %vm55_vm0, %v45_v13  ;;  %362 = vmatpush.msra.mxu2 %v2142_v7 }
  0x11   :  { %1813 = vmatmul.msk.f32.gmra.mxu1 %vm55_vm0, %v45_v13  ;;  %1815 = vmatmul.msk.f32.gmra.mxu2 %vm55_vm0, %v45_v13 }
  0x12   :  { %323 = vmatpush.msra.mxu0 %v2144_v8  ;;  %343 = vmatpush.msra.mxu1 %v2147_v9 }
  0x13   :  { %1817 = vmatmul.msk.f32.gmra.mxu3 %vm55_vm0, %v45_v13  ;;  %363 = vmatpush.msra.mxu2 %v2153_v11 }
  0x14   :  { %382 = vmatpush.msra.mxu3 %v2149_v10 }
  0x16   :  { %383 = vmatpush.msra.mxu3 %v2157_v12 }
  0x18   :  { %174 = vmatmul.f32.vlgmr.msrb.gmra.mxu0 %v2112_v14 }
  0x19   :  { %194 = vmatmul.f32.vlgmr.msrb.gmra.mxu1 %v2112_v14  ;;  %214 = vmatmul.f32.vlgmr.msrb.gmra.mxu2 %v2112_v14 }
  0x1a   :  { %488 = vmatpush.msrb.mxu0 %v2135_v5  ;;  %508 = vmatpush.msrb.mxu1 %v2138_v6 }
  0x1b   :  { %234 = vmatmul.f32.vlgmr.msrb.gmra.mxu3 %v2112_v14  ;;  %528 = vmatpush.msrb.mxu2 %v2142_v7 }
  0x1c   :  { %489 = vmatpush.msrb.mxu0 %v2144_v8  ;;  %509 = vmatpush.msrb.mxu1 %v2147_v9 }
  0x1d   :  { %548 = vmatpush.msrb.mxu3 %v2149_v10  ;;  %529 = vmatpush.msrb.mxu2 %v2153_v11 }
  0x1f   :  { %549 = vmatpush.msrb.mxu3 %v2157_v12 }
  0x85   :  { %v79_v15 = vpop.f32.mrf.mxu0 }
  0x86   :  { %v102_v16 = vpop.f32.mrf.mxu1  ;;  %v2190_v27 = vadd.f32 %v79_v15, %v47_v18 }
  0x87   :  { %v2192_v29 = vadd.f32 %v102_v16, %v48_v20 }
  0x8c   :  { %v125_v19 = vpop.f32.mrf.mxu2 }
  0x8d   :  { %v82_v21 = vpop.f32.mrf.mxu0  ;;  %v2200_v40 = vadd.f32 %v125_v19, %v49_v26 }
  0x8e   :  { %v148_v22 = vpop.f32.mrf.mxu3  ;;  %v2186_v23 = vadd.f32 %v82_v21, %v47_v18  ;;  %v105_v24 = vpop.f32.mrf.mxu1 }
  0x8f   :  { %v2188_v25 = vadd.f32 %v105_v24, %v48_v20  ;;  %v2203_v48 = vadd.f32 %v148_v22, %v50_v30 }
  0x94   :  { %v128_v28 = vpop.f32.mrf.mxu2 }
  0x95   :  { %v2194_v31 = vadd.f32 %v128_v28, %v49_v26  ;;  %v175_v32 = vpop.f32.mrf.mxu0 }
  0x96   :  { %v151_v33 = vpop.f32.mrf.mxu3  ;;  %v238_v34 = vadd.f32 %v175_v32, %v2190_v27  ;;  %v195_v35 = vpop.f32.mrf.mxu1 }
  0x97   :  { %v2197_v36 = vadd.f32 %v151_v33, %v50_v30  ;;  %v239_v37 = vadd.f32 %v195_v35, %v2192_v29 }
  0x98   :  { %v1818_v38 = vmul.f32 -1.442695, %v238_v34 }
  0x99   :  { %v1819_v39 = vmul.f32 -1.442695, %v239_v37 }
  0x9a   :  { %1889 = vpow2.f32 %v1818_v38 }
  0x9b   :  { %1891 = vpow2.f32 %v1819_v39 }
  0x9c   :  { %v215_v41 = vpop.f32.mrf.mxu2 }
  0x9d   :  { %v240_v42 = vadd.f32 %v215_v41, %v2200_v40 }
  0x9e   :  { %v235_v49 = vpop.f32.mrf.mxu3 }
  0x9f   :  { %v1820_v43 = vmul.f32 -1.442695, %v240_v42  ;;  %v241_v53 = vadd.f32 %v235_v49, %v2203_v48 }
  0xa0   :  { %v1890_v44 = vpop.eup %1889 }
  0xa1   :  { %v1892_v45 = vpop.eup %1891  ;;  %v251_v46 = vadd.f32 1.0, %v1890_v44  ;;  %1893 = vpow2.f32 %v1820_v43 }
  0xa2   :  { %v252_v47 = vadd.f32 1.0, %v1892_v45 }
  0xa3   :  { %1895 = vrcp.f32 %v251_v46  ;;  %v265_v59 = vand.u32 2147483648, %v251_v46  ;;  %v263_v62 = vand.u32 2147483647, %v251_v46  ;;  %vm259_vm3 = vweird.f32 %v251_v46 }
  0xa4   :  { %1897 = vrcp.f32 %v252_v47  ;;  %v280_v60 = vand.u32 2147483648, %v252_v47  ;;  %v278_v0 = vand.u32 2147483647, %v252_v47  ;;  %vm274_vm4 = vweird.f32 %v252_v47 }
  0xa5   :  { %v266_v4 = vor.u32 1.1754944e-38, %v265_v59  ;;  %vm264_vm6 = vcmp.eq.f32.partialorder %v263_v62, 8.507059e+37 }
  0xa6   :  { %v281_v14 = vor.u32 1.1754944e-38, %v280_v60  ;;  %vm279_vm8 = vcmp.eq.f32.partialorder %v278_v0, 8.507059e+37 }
  0xa7   :  { %v1894_v50 = vpop.eup %1893 }
  0xa8   :  { %v253_v51 = vadd.f32 1.0, %v1894_v50 }
  0xa9   :  { %v1896_v52 = vpop.eup %1895 }
  0xaa   :  { %v1898_v54 = vpop.eup %1897  ;;  %v255_v55 = vmul.f32 %v1896_v52, %v251_v46  ;;  %1899 = vrcp.f32 %v253_v51  ;;  %vm260_vm1 = vweird.f32 %v1896_v52  ;;  %v295_v30 = vand.u32 2147483648, %v253_v51 }
  0xab   :  { %v270_v56 = vmul.f32 %v1898_v54, %v252_v47  ;;  %1901 = vtanh.f32 %v241_v53  ;;  %vm275_vm2 = vweird.f32 %v1898_v54  ;;  %vm261_vm5 = vmor %vm259_vm3, %vm260_vm1  ;;  %vm289_vm10 = vweird.f32 %v253_v51 }
  0xac   :  { %v256_v57 = vsub.f32 1.0, %v255_v55  ;;  %vm276_vm7 = vmor %vm274_vm4, %vm275_vm2  ;;  %v293_v32 = vand.u32 2147483647, %v253_v51  ;;  %v296_v34 = vor.u32 1.1754944e-38, %v295_v30 }
  0xad   :  { %v271_v58 = vsub.f32 1.0, %v270_v56 }
  0xae   :  { %v257_v61 = vmul.f32 %v1896_v52, %v256_v57  ;;  %vm294_vm12 = vcmp.eq.f32.partialorder %v293_v32, 8.507059e+37 }
  0xaf   :  { %v272_v63 = vmul.f32 %v1898_v54, %v271_v58 }
  0xb0   :  { %v1900_v1 = vpop.eup %1899  ;;  %v258_v2 = vadd.f32 %v1896_v52, %v257_v61 }
  0xb1   :  { %v285_v3 = vmul.f32 %v1900_v1, %v253_v51  ;;  %v273_v13 = vadd.f32 %v1898_v54, %v272_v63  ;;  %v1902_v16 = vpop.eup %1901  ;;  %vm290_vm9 = vweird.f32 %v1900_v1 }
  0xb2   :  { %v262_v15 = vsel %vm261_vm5, %v1896_v52, %v258_v2  ;;  %vm291_vm11 = vmor %vm289_vm10, %vm290_vm9 }
  0xb3   :  { %v286_v17 = vsub.f32 1.0, %v285_v3  ;;  %v267_v18 = vsel %vm264_vm6, %v266_v4, %v262_v15  ;;  %v277_v19 = vsel %vm276_vm7, %v1898_v54, %v273_v13 }
  0xb4   :  { %v282_v20 = vsel %vm279_vm8, %v281_v14, %v277_v19  ;;  %v301_v21 = vmul.f32 %v1902_v16, %v267_v18 }
  0xb5   :  { %v287_v22 = vmul.f32 %v1900_v1, %v286_v17  ;;  %v300_v24 = vmul.f32 0.0, %v282_v20 }
  0xb7   :  { %v2206_v26 = vadd.f32 %v301_v21, %v300_v24  ;;  %v288_v28 = vadd.f32 %v1900_v1, %v287_v22 }
  0xb9   :  { %1903 = vtanh.f32 %v2206_v26  ;;  %v292_v33 = vsel %vm291_vm11, %v1900_v1, %v288_v28  ;;  %v463_v24 = vrot.slane %v2206_v26, 7 }
  0xba   :  { %v297_v37 = vsel %vm294_vm12, %v296_v34, %v292_v33 }
  0xbf   :  { %v1904_v35 = vpop.eup %1903 }
  0xc0   :  { %v304_v38 = vmul.f32 %v1904_v35, %v297_v37 }
  0xc2   :  { %1821 = vmatmul.msk.f32.vlgmr.msra.gmra.mxu0 %vm154_vm13, %v304_v38  ;;  %1822 = vmatmul.msk.f32.vlgmr.msra.gmra.mxu1 %vm154_vm13, %v304_v38 }
  0xc3   :  { %1823 = vmatmul.msk.f32.vlgmr.msra.gmra.mxu2 %vm154_vm13, %v304_v38  ;;  %1824 = vmatmul.msk.f32.vlgmr.msra.gmra.mxu3 %vm154_vm13, %v304_v38 }
  0xc4   :  { %654 = vmatpush.msra.mxu0 %v2135_v5  ;;  %674 = vmatpush.msra.mxu1 %v2138_v6 }
  0xc5   :  { %694 = vmatpush.msra.mxu2 %v2142_v7  ;;  %714 = vmatpush.msra.mxu3 %v2149_v10 }
  0xc6   :  { %655 = vmatpush.msra.mxu0 %v2144_v8  ;;  %675 = vmatpush.msra.mxu1 %v2147_v9 }
  0xc7   :  { %695 = vmatpush.msra.mxu2 %v2153_v11  ;;  %715 = vmatpush.msra.mxu3 %v2157_v12 }
 0x13f   :  { %v325_v39 = vpop.f32.mrf.mxu0  ;;  %v345_v41 = vpop.f32.mrf.mxu1 }
 0x140   :  { %v392_v42 = vrot.slane %v325_v39, 7  ;;  %v393_v43 = vrot.slane %v345_v41, 7 }
 0x142   :  { %v400_v44 = vadd.f32 %v392_v42, %v2190_v27  ;;  %v401_v45 = vadd.f32 %v393_v43, %v2192_v29 }
 0x144   :  { %v1825_v46 = vmul.f32 -1.442695, %v400_v44  ;;  %v1826_v47 = vmul.f32 -1.442695, %v401_v45 }
 0x146   :  { %1905 = vpow2.f32 %v1825_v46  ;;  %v365_v49 = vpop.f32.mrf.mxu2  ;;  %v385_v57 = vpop.f32.mrf.mxu3 }
 0x147   :  { %1907 = vpow2.f32 %v1826_v47  ;;  %v394_v50 = vrot.slane %v365_v49, 7  ;;  %v395_v58 = vrot.slane %v385_v57, 7 }
 0x149   :  { %v402_v51 = vadd.f32 %v394_v50, %v2200_v40  ;;  %v403_v62 = vadd.f32 %v395_v58, %v2203_v48 }
 0x14b   :  { %v1827_v52 = vmul.f32 -1.442695, %v402_v51 }
 0x14c   :  { %v1906_v53 = vpop.eup %1905 }
 0x14d   :  { %v1908_v54 = vpop.eup %1907  ;;  %v413_v55 = vadd.f32 1.0, %v1906_v53  ;;  %1909 = vpow2.f32 %v1827_v52 }
 0x14e   :  { %v414_v56 = vadd.f32 1.0, %v1908_v54 }
 0x14f   :  { %1911 = vrcp.f32 %v413_v55  ;;  %v427_v4 = vand.u32 2147483648, %v413_v55  ;;  %v425_v15 = vand.u32 2147483647, %v413_v55  ;;  %vm421_vm0 = vweird.f32 %v413_v55 }
 0x150   :  { %1913 = vrcp.f32 %v414_v56  ;;  %v442_v13 = vand.u32 2147483648, %v414_v56  ;;  %v440_v17 = vand.u32 2147483647, %v414_v56  ;;  %vm436_vm1 = vweird.f32 %v414_v56 }
 0x151   :  { %v428_v21 = vor.u32 1.1754944e-38, %v427_v4  ;;  %vm426_vm4 = vcmp.eq.f32.partialorder %v425_v15, 8.507059e+37 }
 0x152   :  { %v443_v28 = vor.u32 1.1754944e-38, %v442_v13  ;;  %vm441_vm5 = vcmp.eq.f32.partialorder %v440_v17, 8.507059e+37 }
 0x153   :  { %v1910_v59 = vpop.eup %1909 }
 0x154   :  { %v415_v60 = vadd.f32 1.0, %v1910_v59 }
 0x155   :  { %v1912_v61 = vpop.eup %1911 }
 0x156   :  { %v1914_v63 = vpop.eup %1913  ;;  %v417_v0 = vmul.f32 %v1912_v61, %v413_v55  ;;  %1915 = vrcp.f32 %v415_v60  ;;  %vm422_vm14 = vweird.f32 %v1912_v61  ;;  %v457_v44 = vand.u32 2147483648, %v415_v60 }
 0x157   :  { %v432_v1 = vmul.f32 %v1914_v63, %v414_v56  ;;  %1917 = vtanh.f32 %v403_v62  ;;  %vm437_vm15 = vweird.f32 %v1914_v63  ;;  %vm423_vm2 = vmor %vm421_vm0, %vm422_vm14  ;;  %vm451_vm7 = vweird.f32 %v415_v60 }
 0x158   :  { %v418_v2 = vsub.f32 1.0, %v417_v0  ;;  %vm438_vm3 = vmor %vm436_vm1, %vm437_vm15  ;;  %v455_v26 = vand.u32 2147483647, %v415_v60  ;;  %v458_v46 = vor.u32 1.1754944e-38, %v457_v44 }
 0x159   :  { %v433_v3 = vsub.f32 1.0, %v432_v1 }
 0x15a   :  { %v419_v14 = vmul.f32 %v1912_v61, %v418_v2  ;;  %vm456_vm9 = vcmp.eq.f32.partialorder %v455_v26, 8.507059e+37 }
 0x15b   :  { %v434_v16 = vmul.f32 %v1914_v63, %v433_v3 }
 0x15c   :  { %v1916_v18 = vpop.eup %1915  ;;  %v420_v19 = vadd.f32 %v1912_v61, %v419_v14 }
 0x15d   :  { %v447_v20 = vmul.f32 %v1916_v18, %v415_v60  ;;  %v435_v22 = vadd.f32 %v1914_v63, %v434_v16  ;;  %v1918_v32 = vpop.eup %1917  ;;  %vm452_vm6 = vweird.f32 %v1916_v18 }
 0x15e   :  { %v424_v30 = vsel %vm423_vm2, %v1912_v61, %v420_v19  ;;  %vm453_vm8 = vmor %vm451_vm7, %vm452_vm6 }
 0x15f   :  { %v448_v33 = vsub.f32 1.0, %v447_v20  ;;  %v429_v34 = vsel %vm426_vm4, %v428_v21, %v424_v30  ;;  %v439_v35 = vsel %vm438_vm3, %v1914_v63, %v435_v22 }
 0x160   :  { %v444_v37 = vsel %vm441_vm5, %v443_v28, %v439_v35  ;;  %v466_v38 = vmul.f32 %v1918_v32, %v429_v34 }
 0x161   :  { %v449_v39 = vmul.f32 %v1916_v18, %v448_v33  ;;  %v465_v41 = vmul.f32 %v463_v24, %v444_v37 }
 0x163   :  { %v2226_v42 = vadd.f32 %v466_v38, %v465_v41  ;;  %v450_v43 = vadd.f32 %v1916_v18, %v449_v39 }
 0x165   :  { %1919 = vtanh.f32 %v2226_v42  ;;  %v454_v45 = vsel %vm453_vm8, %v1916_v18, %v450_v43  ;;  %v629_v43 = vrot.slane %v2226_v42, 7 }
 0x166   :  { %v459_v49 = vsel %vm456_vm9, %v458_v46, %v454_v45 }
 0x16b   :  { %v1920_v47 = vpop.eup %1919 }
 0x16c   :  { %v469_v50 = vmul.f32 %v1920_v47, %v459_v49 }
 0x16e   :  { %v471_v51 = vrot.slane %v469_v50, 1 }
 0x170   :  { %1828 = vmatmul.msk.f32.vlgmr.msrb.gmra.mxu0 %vm154_vm13, %v471_v51  ;;  %1829 = vmatmul.msk.f32.vlgmr.msrb.gmra.mxu1 %vm154_vm13, %v471_v51 }
 0x171   :  { %1830 = vmatmul.msk.f32.vlgmr.msrb.gmra.mxu2 %vm154_vm13, %v471_v51  ;;  %1831 = vmatmul.msk.f32.vlgmr.msrb.gmra.mxu3 %vm154_vm13, %v471_v51 }
 0x172   :  { %820 = vmatpush.msrb.mxu0 %v2135_v5  ;;  %840 = vmatpush.msrb.mxu1 %v2138_v6 }
 0x173   :  { %860 = vmatpush.msrb.mxu2 %v2142_v7  ;;  %880 = vmatpush.msrb.mxu3 %v2149_v10 }
 0x174   :  { %821 = vmatpush.msrb.mxu0 %v2144_v8  ;;  %841 = vmatpush.msrb.mxu1 %v2147_v9 }
 0x175   :  { %861 = vmatpush.msrb.mxu2 %v2153_v11  ;;  %881 = vmatpush.msrb.mxu3 %v2157_v12 }
 0x1ed   :  { %v491_v52 = vpop.f32.mrf.mxu0  ;;  %v511_v53 = vpop.f32.mrf.mxu1 }
 0x1ee   :  { %v558_v54 = vrot.slane %v491_v52, 6  ;;  %v559_v55 = vrot.slane %v511_v53, 6 }
 0x1f0   :  { %v566_v56 = vadd.f32 %v558_v54, %v2190_v27  ;;  %v567_v57 = vadd.f32 %v559_v55, %v2192_v29 }
 0x1f2   :  { %v1832_v58 = vmul.f32 -1.442695, %v566_v56  ;;  %v1833_v59 = vmul.f32 -1.442695, %v567_v57 }
 0x1f4   :  { %1921 = vpow2.f32 %v1832_v58  ;;  %v531_v60 = vpop.f32.mrf.mxu2  ;;  %v551_v4 = vpop.f32.mrf.mxu3 }
 0x1f5   :  { %1923 = vpow2.f32 %v1833_v59  ;;  %v560_v61 = vrot.slane %v531_v60, 6  ;;  %v561_v13 = vrot.slane %v551_v4, 6 }
 0x1f7   :  { %v568_v62 = vadd.f32 %v560_v61, %v2200_v40  ;;  %v569_v17 = vadd.f32 %v561_v13, %v2203_v48 }
 0x1f9   :  { %v1834_v63 = vmul.f32 -1.442695, %v568_v62 }
 0x1fa   :  { %v1922_v0 = vpop.eup %1921 }
 0x1fb   :  { %v1924_v1 = vpop.eup %1923  ;;  %v579_v2 = vadd.f32 1.0, %v1922_v0  ;;  %1925 = vpow2.f32 %v1834_v63 }
 0x1fc   :  { %v580_v3 = vadd.f32 1.0, %v1924_v1 }
 0x1fd   :  { %1927 = vrcp.f32 %v579_v2  ;;  %v593_v24 = vand.u32 2147483648, %v579_v2  ;;  %v591_v32 = vand.u32 2147483647, %v579_v2  ;;  %vm587_vm12 = vweird.f32 %v579_v2 }
 0x1fe   :  { %1929 = vrcp.f32 %v580_v3  ;;  %v608_v28 = vand.u32 2147483648, %v580_v3  ;;  %v606_v34 = vand.u32 2147483647, %v580_v3  ;;  %vm602_vm14 = vweird.f32 %v580_v3 }
 0x1ff   :  { %v594_v39 = vor.u32 1.1754944e-38, %v593_v24  ;;  %vm592_vm1 = vcmp.eq.f32.partialorder %v591_v32, 8.507059e+37 }
 0x200   :  { %v609_v44 = vor.u32 1.1754944e-38, %v608_v28  ;;  %vm607_vm2 = vcmp.eq.f32.partialorder %v606_v34, 8.507059e+37 }
 0x201   :  { %v1926_v14 = vpop.eup %1925 }
 0x202   :  { %v581_v15 = vadd.f32 1.0, %v1926_v14 }
 0x203   :  { %v1928_v16 = vpop.eup %1927 }
 0x204   :  { %v1930_v18 = vpop.eup %1929  ;;  %v583_v19 = vmul.f32 %v1928_v16, %v579_v2  ;;  %1931 = vrcp.f32 %v581_v15  ;;  %vm588_vm10 = vweird.f32 %v1928_v16  ;;  %v623_v56 = vand.u32 2147483648, %v581_v15 }
 0x205   :  { %v598_v20 = vmul.f32 %v1930_v18, %v580_v3  ;;  %1933 = vtanh.f32 %v569_v17  ;;  %vm603_vm11 = vweird.f32 %v1930_v18  ;;  %vm589_vm15 = vmor %vm587_vm12, %vm588_vm10  ;;  %vm617_vm4 = vweird.f32 %v581_v15 }
 0x206   :  { %v584_v21 = vsub.f32 1.0, %v583_v19  ;;  %vm604_vm0 = vmor %vm602_vm14, %vm603_vm11  ;;  %v621_v42 = vand.u32 2147483647, %v581_v15  ;;  %v624_v58 = vor.u32 1.1754944e-38, %v623_v56 }
 0x207   :  { %v599_v22 = vsub.f32 1.0, %v598_v20 }
 0x208   :  { %v585_v30 = vmul.f32 %v1928_v16, %v584_v21  ;;  %vm622_vm6 = vcmp.eq.f32.partialorder %v621_v42, 8.507059e+37 }
 0x209   :  { %v600_v33 = vmul.f32 %v1930_v18, %v599_v22 }
 0x20a   :  { %v1932_v35 = vpop.eup %1931  ;;  %v586_v37 = vadd.f32 %v1928_v16, %v585_v30 }
 0x20b   :  { %v613_v38 = vmul.f32 %v1932_v35, %v581_v15  ;;  %v601_v41 = vadd.f32 %v1930_v18, %v600_v33  ;;  %v1934_v45 = vpop.eup %1933  ;;  %vm618_vm3 = vweird.f32 %v1932_v35 }
 0x20c   :  { %v590_v26 = vsel %vm589_vm15, %v1928_v16, %v586_v37  ;;  %vm619_vm5 = vmor %vm617_vm4, %vm618_vm3 }
 0x20d   :  { %v614_v46 = vsub.f32 1.0, %v613_v38  ;;  %v595_v47 = vsel %vm592_vm1, %v594_v39, %v590_v26  ;;  %v605_v49 = vsel %vm604_vm0, %v1930_v18, %v601_v41 }
 0x20e   :  { %v610_v50 = vsel %vm607_vm2, %v609_v44, %v605_v49  ;;  %v632_v51 = vmul.f32 %v1934_v45, %v595_v47 }
 0x20f   :  { %v615_v52 = vmul.f32 %v1932_v35, %v614_v46  ;;  %v631_v53 = vmul.f32 %v629_v43, %v610_v50 }
 0x211   :  { %v2246_v54 = vadd.f32 %v632_v51, %v631_v53  ;;  %v616_v55 = vadd.f32 %v1932_v35, %v615_v52 }
 0x213   :  { %1935 = vtanh.f32 %v2246_v54  ;;  %v620_v57 = vsel %vm619_vm5, %v1932_v35, %v616_v55  ;;  %v795_v55 = vrot.slane %v2246_v54, 7 }
 0x214   :  { %v625_v60 = vsel %vm622_vm6, %v624_v58, %v620_v57 }
 0x219   :  { %v1936_v59 = vpop.eup %1935 }
 0x21a   :  { %v635_v61 = vmul.f32 %v1936_v59, %v625_v60 }
 0x21c   :  { %v637_v62 = vrot.slane %v635_v61, 2 }
 0x21e   :  { %1835 = vmatmul.msk.f32.vlgmr.msra.gmra.mxu0 %vm154_vm13, %v637_v62  ;;  %1836 = vmatmul.msk.f32.vlgmr.msra.gmra.mxu1 %vm154_vm13, %v637_v62 }
 0x21f   :  { %1837 = vmatmul.msk.f32.vlgmr.msra.gmra.mxu2 %vm154_vm13, %v637_v62  ;;  %1838 = vmatmul.msk.f32.vlgmr.msra.gmra.mxu3 %vm154_vm13, %v637_v62 }
 0x220   :  { %986 = vmatpush.msra.mxu0 %v2135_v5  ;;  %1006 = vmatpush.msra.mxu1 %v2138_v6 }
 0x221   :  { %1026 = vmatpush.msra.mxu2 %v2142_v7  ;;  %1046 = vmatpush.msra.mxu3 %v2149_v10 }
 0x222   :  { %987 = vmatpush.msra.mxu0 %v2144_v8  ;;  %1007 = vmatpush.msra.mxu1 %v2147_v9 }
 0x223   :  { %1027 = vmatpush.msra.mxu2 %v2153_v11  ;;  %1047 = vmatpush.msra.mxu3 %v2157_v12 }
 0x29b   :  { %v657_v63 = vpop.f32.mrf.mxu0  ;;  %v677_v0 = vpop.f32.mrf.mxu1 }
 0x29c   :  { %v724_v1 = vrot.slane %v657_v63, 5  ;;  %v725_v2 = vrot.slane %v677_v0, 5 }
 0x29e   :  { %v732_v3 = vadd.f32 %v724_v1, %v2190_v27  ;;  %v733_v4 = vadd.f32 %v725_v2, %v2192_v29 }
 0x2a0   :  { %v1839_v13 = vmul.f32 -1.442695, %v732_v3  ;;  %v1840_v14 = vmul.f32 -1.442695, %v733_v4 }
 0x2a2   :  { %1937 = vpow2.f32 %v1839_v13  ;;  %v697_v15 = vpop.f32.mrf.mxu2  ;;  %v717_v24 = vpop.f32.mrf.mxu3 }
 0x2a3   :  { %1939 = vpow2.f32 %v1840_v14  ;;  %v726_v16 = vrot.slane %v697_v15, 5  ;;  %v727_v28 = vrot.slane %v717_v24, 5 }
 0x2a5   :  { %v734_v17 = vadd.f32 %v726_v16, %v2200_v40  ;;  %v735_v34 = vadd.f32 %v727_v28, %v2203_v48 }
 0x2a7   :  { %v1841_v18 = vmul.f32 -1.442695, %v734_v17 }
 0x2a8   :  { %v1938_v19 = vpop.eup %1937 }
 0x2a9   :  { %v1940_v20 = vpop.eup %1939  ;;  %v745_v21 = vadd.f32 1.0, %v1938_v19  ;;  %1941 = vpow2.f32 %v1841_v18 }
 0x2aa   :  { %v746_v22 = vadd.f32 1.0, %v1940_v20 }
 0x2ab   :  { %1943 = vrcp.f32 %v745_v21  ;;  %v759_v43 = vand.u32 2147483648, %v745_v21  ;;  %v757_v45 = vand.u32 2147483647, %v745_v21  ;;  %vm753_vm9 = vweird.f32 %v745_v21 }
 0x2ac   :  { %1945 = vrcp.f32 %v746_v22  ;;  %v774_v44 = vand.u32 2147483648, %v746_v22  ;;  %v772_v47 = vand.u32 2147483647, %v746_v22  ;;  %vm768_vm10 = vweird.f32 %v746_v22 }
 0x2ad   :  { %v760_v52 = vor.u32 1.1754944e-38, %v759_v43  ;;  %vm758_vm14 = vcmp.eq.f32.partialorder %v757_v45, 8.507059e+37 }
 0x2ae   :  { %v775_v56 = vor.u32 1.1754944e-38, %v774_v44  ;;  %vm773_vm15 = vcmp.eq.f32.partialorder %v772_v47, 8.507059e+37 }
 0x2af   :  { %v1942_v30 = vpop.eup %1941 }
 0x2b0   :  { %v747_v32 = vadd.f32 1.0, %v1942_v30 }
 0x2b1   :  { %v1944_v33 = vpop.eup %1943 }
 0x2b2   :  { %v1946_v35 = vpop.eup %1945  ;;  %v749_v37 = vmul.f32 %v1944_v33, %v745_v21  ;;  %1947 = vrcp.f32 %v747_v32  ;;  %vm754_vm7 = vweird.f32 %v1944_v33  ;;  %v789_v3 = vand.u32 2147483648, %v747_v32 }
 0x2b3   :  { %v764_v38 = vmul.f32 %v1946_v35, %v746_v22  ;;  %1949 = vtanh.f32 %v735_v34  ;;  %vm769_vm8 = vweird.f32 %v1946_v35  ;;  %vm755_vm11 = vmor %vm753_vm9, %vm754_vm7  ;;  %vm783_vm1 = vweird.f32 %v747_v32 }
 0x2b4   :  { %v750_v39 = vsub.f32 1.0, %v749_v37  ;;  %vm770_vm12 = vmor %vm768_vm10, %vm769_vm8  ;;  %v787_v54 = vand.u32 2147483647, %v747_v32  ;;  %v790_v13 = vor.u32 1.1754944e-38, %v789_v3 }
 0x2b5   :  { %v765_v41 = vsub.f32 1.0, %v764_v38 }
 0x2b6   :  { %v751_v26 = vmul.f32 %v1944_v33, %v750_v39  ;;  %vm788_vm3 = vcmp.eq.f32.partialorder %v787_v54, 8.507059e+37 }
 0x2b7   :  { %v766_v46 = vmul.f32 %v1946_v35, %v765_v41 }
 0x2b8   :  { %v1948_v49 = vpop.eup %1947  ;;  %v752_v50 = vadd.f32 %v1944_v33, %v751_v26 }
 0x2b9   :  { %v779_v51 = vmul.f32 %v1948_v49, %v747_v32  ;;  %v767_v53 = vadd.f32 %v1946_v35, %v766_v46  ;;  %v1950_v57 = vpop.eup %1949  ;;  %vm784_vm0 = vweird.f32 %v1948_v49 }
 0x2ba   :  { %v756_v42 = vsel %vm755_vm11, %v1944_v33, %v752_v50  ;;  %vm785_vm2 = vmor %vm783_vm1, %vm784_vm0 }
 0x2bb   :  { %v780_v58 = vsub.f32 1.0, %v779_v51  ;;  %v761_v59 = vsel %vm758_vm14, %v760_v52, %v756_v42  ;;  %v771_v60 = vsel %vm770_vm12, %v1946_v35, %v767_v53 }
 0x2bc   :  { %v776_v61 = vsel %vm773_vm15, %v775_v56, %v771_v60  ;;  %v798_v62 = vmul.f32 %v1950_v57, %v761_v59 }
 0x2bd   :  { %v781_v63 = vmul.f32 %v1948_v49, %v780_v58  ;;  %v797_v0 = vmul.f32 %v795_v55, %v776_v61 }
 0x2bf   :  { %v2266_v1 = vadd.f32 %v798_v62, %v797_v0  ;;  %v782_v2 = vadd.f32 %v1948_v49, %v781_v63 }
 0x2c1   :  { %1951 = vtanh.f32 %v2266_v1  ;;  %v786_v4 = vsel %vm785_vm2, %v1948_v49, %v782_v2  ;;  %v961_v2 = vrot.slane %v2266_v1, 7 }
 0x2c2   :  { %v791_v15 = vsel %vm788_vm3, %v790_v13, %v786_v4 }
 0x2c7   :  { %v1952_v14 = vpop.eup %1951 }
 0x2c8   :  { %v801_v16 = vmul.f32 %v1952_v14, %v791_v15 }
 0x2ca   :  { %v803_v17 = vrot.slane %v801_v16, 3 }
 0x2cc   :  { %1842 = vmatmul.msk.f32.vlgmr.msrb.gmra.mxu0 %vm154_vm13, %v803_v17  ;;  %1843 = vmatmul.msk.f32.vlgmr.msrb.gmra.mxu1 %vm154_vm13, %v803_v17 }
 0x2cd   :  { %1844 = vmatmul.msk.f32.vlgmr.msrb.gmra.mxu2 %vm154_vm13, %v803_v17  ;;  %1845 = vmatmul.msk.f32.vlgmr.msrb.gmra.mxu3 %vm154_vm13, %v803_v17 }
 0x2ce   :  { %1152 = vmatpush.msrb.mxu0 %v2135_v5  ;;  %1172 = vmatpush.msrb.mxu1 %v2138_v6 }
 0x2cf   :  { %1192 = vmatpush.msrb.mxu2 %v2142_v7  ;;  %1212 = vmatpush.msrb.mxu3 %v2149_v10 }
 0x2d0   :  { %1153 = vmatpush.msrb.mxu0 %v2144_v8  ;;  %1173 = vmatpush.msrb.mxu1 %v2147_v9 }
 0x2d1   :  { %1193 = vmatpush.msrb.mxu2 %v2153_v11  ;;  %1213 = vmatpush.msrb.mxu3 %v2157_v12 }
 0x349   :  { %v823_v18 = vpop.f32.mrf.mxu0  ;;  %v843_v19 = vpop.f32.mrf.mxu1 }
 0x34a   :  { %v890_v20 = vrot.slane %v823_v18, 4  ;;  %v891_v21 = vrot.slane %v843_v19, 4 }
 0x34c   :  { %v898_v22 = vadd.f32 %v890_v20, %v2190_v27  ;;  %v899_v24 = vadd.f32 %v891_v21, %v2192_v29 }
 0x34e   :  { %v1846_v28 = vmul.f32 -1.442695, %v898_v22  ;;  %v1847_v30 = vmul.f32 -1.442695, %v899_v24 }
 0x350   :  { %1953 = vpow2.f32 %v1846_v28  ;;  %v863_v32 = vpop.f32.mrf.mxu2  ;;  %v883_v43 = vpop.f32.mrf.mxu3 }
 0x351   :  { %1955 = vpow2.f32 %v1847_v30  ;;  %v892_v33 = vrot.slane %v863_v32, 4  ;;  %v893_v44 = vrot.slane %v883_v43, 4 }
 0x353   :  { %v900_v34 = vadd.f32 %v892_v33, %v2200_v40  ;;  %v901_v47 = vadd.f32 %v893_v44, %v2203_v48 }
 0x355   :  { %v1848_v35 = vmul.f32 -1.442695, %v900_v34 }
 0x356   :  { %v1954_v37 = vpop.eup %1953 }
 0x357   :  { %v1956_v38 = vpop.eup %1955  ;;  %v911_v39 = vadd.f32 1.0, %v1954_v37  ;;  %1957 = vpow2.f32 %v1848_v35 }
 0x358   :  { %v912_v41 = vadd.f32 1.0, %v1956_v38 }
 0x359   :  { %1959 = vrcp.f32 %v911_v39  ;;  %v925_v55 = vand.u32 2147483648, %v911_v39  ;;  %v923_v57 = vand.u32 2147483647, %v911_v39  ;;  %vm919_vm6 = vweird.f32 %v911_v39 }
 0x35a   :  { %1961 = vrcp.f32 %v912_v41  ;;  %v940_v56 = vand.u32 2147483648, %v912_v41  ;;  %v938_v59 = vand.u32 2147483647, %v912_v41  ;;  %vm934_vm7 = vweird.f32 %v912_v41 }
 0x35b   :  { %v926_v63 = vor.u32 1.1754944e-38, %v925_v55  ;;  %vm924_vm10 = vcmp.eq.f32.partialorder %v923_v57, 8.507059e+37 }
 0x35c   :  { %v941_v3 = vor.u32 1.1754944e-38, %v940_v56  ;;  %vm939_vm11 = vcmp.eq.f32.partialorder %v938_v59, 8.507059e+37 }
 0x35d   :  { %v1958_v26 = vpop.eup %1957 }
 0x35e   :  { %v913_v45 = vadd.f32 1.0, %v1958_v26 }
 0x35f   :  { %v1960_v46 = vpop.eup %1959 }
 0x360   :  { %v1962_v49 = vpop.eup %1961  ;;  %v915_v50 = vmul.f32 %v1960_v46, %v911_v39  ;;  %1963 = vrcp.f32 %v913_v45  ;;  %vm920_vm4 = vweird.f32 %v1960_v46  ;;  %v955_v22 = vand.u32 2147483648, %v913_v45 }
 0x361   :  { %v930_v51 = vmul.f32 %v1962_v49, %v912_v41  ;;  %1965 = vtanh.f32 %v901_v47  ;;  %vm935_vm5 = vweird.f32 %v1962_v49  ;;  %vm921_vm8 = vmor %vm919_vm6, %vm920_vm4  ;;  %vm949_vm14 = vweird.f32 %v913_v45 }
 0x362   :  { %v916_v52 = vsub.f32 1.0, %v915_v50  ;;  %vm936_vm9 = vmor %vm934_vm7, %vm935_vm5  ;;  %v953_v1 = vand.u32 2147483647, %v913_v45  ;;  %v956_v28 = vor.u32 1.1754944e-38, %v955_v22 }
 0x363   :  { %v931_v53 = vsub.f32 1.0, %v930_v51 }
 0x364   :  { %v917_v42 = vmul.f32 %v1960_v46, %v916_v52  ;;  %vm954_vm0 = vcmp.eq.f32.partialorder %v953_v1, 8.507059e+37 }
 0x365   :  { %v932_v58 = vmul.f32 %v1962_v49, %v931_v53 }
 0x366   :  { %v1964_v60 = vpop.eup %1963  ;;  %v918_v61 = vadd.f32 %v1960_v46, %v917_v42 }
 0x367   :  { %v945_v62 = vmul.f32 %v1964_v60, %v913_v45  ;;  %v933_v0 = vadd.f32 %v1962_v49, %v932_v58  ;;  %v1966_v4 = vpop.eup %1965  ;;  %vm950_vm12 = vweird.f32 %v1964_v60 }
 0x368   :  { %v922_v54 = vsel %vm921_vm8, %v1960_v46, %v918_v61  ;;  %vm951_vm15 = vmor %vm949_vm14, %vm950_vm12 }
 0x369   :  { %v946_v13 = vsub.f32 1.0, %v945_v62  ;;  %v927_v14 = vsel %vm924_vm10, %v926_v63, %v922_v54  ;;  %v937_v15 = vsel %vm936_vm9, %v1962_v49, %v933_v0 }
 0x36a   :  { %v942_v16 = vsel %vm939_vm11, %v941_v3, %v937_v15  ;;  %v964_v17 = vmul.f32 %v1966_v4, %v927_v14 }
 0x36b   :  { %v947_v18 = vmul.f32 %v1964_v60, %v946_v13  ;;  %v963_v19 = vmul.f32 %v961_v2, %v942_v16 }
 0x36d   :  { %v2286_v20 = vadd.f32 %v964_v17, %v963_v19  ;;  %v948_v21 = vadd.f32 %v1964_v60, %v947_v18 }
 0x36f   :  { %1967 = vtanh.f32 %v2286_v20  ;;  %v952_v24 = vsel %vm951_vm15, %v1964_v60, %v948_v21  ;;  %v1127_v4 = vrot.slane %v2286_v20, 7 }
 0x370   :  { %v957_v32 = vsel %vm954_vm0, %v956_v28, %v952_v24 }
 0x375   :  { %v1968_v30 = vpop.eup %1967 }
 0x376   :  { %v967_v33 = vmul.f32 %v1968_v30, %v957_v32 }
 0x378   :  { %v969_v34 = vrot.slane %v967_v33, 4 }
 0x37a   :  { %1849 = vmatmul.msk.f32.vlgmr.msra.gmra.mxu0 %vm154_vm13, %v969_v34  ;;  %1850 = vmatmul.msk.f32.vlgmr.msra.gmra.mxu1 %vm154_vm13, %v969_v34 }
 0x37b   :  { %1851 = vmatmul.msk.f32.vlgmr.msra.gmra.mxu2 %vm154_vm13, %v969_v34  ;;  %1852 = vmatmul.msk.f32.vlgmr.msra.gmra.mxu3 %vm154_vm13, %v969_v34 }
 0x37c   :  { %1318 = vmatpush.msra.mxu0 %v2135_v5  ;;  %1338 = vmatpush.msra.mxu1 %v2138_v6 }
 0x37d   :  { %1358 = vmatpush.msra.mxu2 %v2142_v7  ;;  %1378 = vmatpush.msra.mxu3 %v2149_v10 }
 0x37e   :  { %1319 = vmatpush.msra.mxu0 %v2144_v8  ;;  %1339 = vmatpush.msra.mxu1 %v2147_v9 }
 0x37f   :  { %1359 = vmatpush.msra.mxu2 %v2153_v11  ;;  %1379 = vmatpush.msra.mxu3 %v2157_v12 }
 0x3f7   :  { %v989_v35 = vpop.f32.mrf.mxu0  ;;  %v1009_v37 = vpop.f32.mrf.mxu1 }
 0x3f8   :  { %v1056_v38 = vrot.slane %v989_v35, 3  ;;  %v1057_v39 = vrot.slane %v1009_v37, 3 }
 0x3fa   :  { %v1064_v5 = vadd.f32 %v1056_v38, %v2190_v27  ;;  %v1065_v6 = vadd.f32 %v1057_v39, %v2192_v29  ;;  %v2313_v39 = vld [vmem:[#allocation2 + $0x40] sm:$0xff] }
 0x3fc   :  { %v1853_v41 = vmul.f32 -1.442695, %v1064_v5  ;;  %v1854_v7 = vmul.f32 -1.442695, %v1065_v6  ;;  %v2316_v5 = vld [vmem:[#allocation2 + $0x48] sm:$0xff]  ;;  %v2319_v6 = vld [vmem:[#allocation2 + $0x50] sm:$0xff] }
 0x3fe   :  { %1969 = vpow2.f32 %v1853_v41  ;;  %v1029_v10 = vpop.f32.mrf.mxu2  ;;  %v1049_v45 = vpop.f32.mrf.mxu3  ;;  %v2322_v41 = vld [vmem:[#allocation2 + $0x58] sm:$0xff] }
 0x3ff   :  { %1971 = vpow2.f32 %v1854_v7  ;;  %v1058_v8 = vrot.slane %v1029_v10, 3  ;;  %v1059_v46 = vrot.slane %v1049_v45, 3  ;;  %v2325_v7 = vld [vmem:[#allocation2 + $0x20] sm:$0xff]  ;;  %v2328_v10 = vld [vmem:[#allocation2 + $0x28] sm:$0xff] }
 0x401   :  { %v1066_v9 = vadd.f32 %v1058_v8, %v2200_v40  ;;  %v1067_v51 = vadd.f32 %v1059_v46, %v2203_v48  ;;  %v2331_v8 = vld [vmem:[#allocation2 + $0x30] sm:$0xff] }
 0x403   :  { %v1855_v43 = vmul.f32 -1.442695, %v1066_v9  ;;  %v2334_v9 = vld [vmem:[#allocation2 + $0x38] sm:$0xff] }
 0x404   :  { %v1970_v11 = vpop.eup %1969 }
 0x405   :  { %v1972_v44 = vpop.eup %1971  ;;  %v1077_v12 = vadd.f32 1.0, %v1970_v11  ;;  %1973 = vpow2.f32 %v1855_v43 }
 0x406   :  { %v1078_v26 = vadd.f32 1.0, %v1972_v44 }
 0x407   :  { %1975 = vrcp.f32 %v1077_v12  ;;  %v1091_v57 = vand.u32 2147483648, %v1077_v12  ;;  %v1089_v60 = vand.u32 2147483647, %v1077_v12  ;;  %vm1085_vm3 = vweird.f32 %v1077_v12 }
 0x408   :  { %1977 = vrcp.f32 %v1078_v26  ;;  %v1106_v58 = vand.u32 2147483648, %v1078_v26  ;;  %v1104_v62 = vand.u32 2147483647, %v1078_v26  ;;  %vm1100_vm4 = vweird.f32 %v1078_v26 }
 0x409   :  { %v1092_v3 = vor.u32 1.1754944e-38, %v1091_v57  ;;  %vm1090_vm7 = vcmp.eq.f32.partialorder %v1089_v60, 8.507059e+37 }
 0x40a   :  { %v1107_v13 = vor.u32 1.1754944e-38, %v1106_v58  ;;  %vm1105_vm8 = vcmp.eq.f32.partialorder %v1104_v62, 8.507059e+37 }
 0x40b   :  { %v1974_v47 = vpop.eup %1973 }
 0x40c   :  { %v1079_v49 = vadd.f32 1.0, %v1974_v47 }
 0x40d   :  { %v1976_v50 = vpop.eup %1975 }
 0x40e   :  { %v1978_v52 = vpop.eup %1977  ;;  %v1081_v53 = vmul.f32 %v1976_v50, %v1077_v12  ;;  %1979 = vrcp.f32 %v1079_v49  ;;  %vm1086_vm1 = vweird.f32 %v1976_v50  ;;  %v1121_v30 = vand.u32 2147483648, %v1079_v49 }
 0x40f   :  { %v1096_v55 = vmul.f32 %v1978_v52, %v1078_v26  ;;  %1981 = vtanh.f32 %v1067_v51  ;;  %vm1101_vm2 = vweird.f32 %v1978_v52  ;;  %vm1087_vm5 = vmor %vm1085_vm3, %vm1086_vm1  ;;  %vm1115_vm10 = vweird.f32 %v1079_v49 }
 0x410   :  { %v1082_v56 = vsub.f32 1.0, %v1081_v53  ;;  %vm1102_vm6 = vmor %vm1100_vm4, %vm1101_vm2  ;;  %v1119_v20 = vand.u32 2147483647, %v1079_v49  ;;  %v1122_v33 = vor.u32 1.1754944e-38, %v1121_v30 }
 0x411   :  { %v1097_v42 = vsub.f32 1.0, %v1096_v55 }
 0x412   :  { %v1083_v59 = vmul.f32 %v1976_v50, %v1082_v56  ;;  %vm1120_vm12 = vcmp.eq.f32.partialorder %v1119_v20, 8.507059e+37 }
 0x413   :  { %v1098_v61 = vmul.f32 %v1978_v52, %v1097_v42 }
 0x414   :  { %v1980_v63 = vpop.eup %1979  ;;  %v1084_v0 = vadd.f32 %v1976_v50, %v1083_v59 }
 0x415   :  { %v1111_v2 = vmul.f32 %v1980_v63, %v1079_v49  ;;  %v1099_v54 = vadd.f32 %v1978_v52, %v1098_v61  ;;  %v1982_v15 = vpop.eup %1981  ;;  %vm1116_vm9 = vweird.f32 %v1980_v63 }
 0x416   :  { %v1088_v14 = vsel %vm1087_vm5, %v1976_v50, %v1084_v0  ;;  %vm1117_vm11 = vmor %vm1115_vm10, %vm1116_vm9 }
 0x417   :  { %v1112_v16 = vsub.f32 1.0, %v1111_v2  ;;  %v1093_v17 = vsel %vm1090_vm7, %v1092_v3, %v1088_v14  ;;  %v1103_v18 = vsel %vm1102_vm6, %v1978_v52, %v1099_v54 }
 0x418   :  { %v1108_v19 = vsel %vm1105_vm8, %v1107_v13, %v1103_v18  ;;  %v1130_v21 = vmul.f32 %v1982_v15, %v1093_v17 }
 0x419   :  { %v1113_v22 = vmul.f32 %v1980_v63, %v1112_v16  ;;  %v1129_v1 = vmul.f32 %v1127_v4, %v1108_v19 }
 0x41b   :  { %v2306_v24 = vadd.f32 %v1130_v21, %v1129_v1  ;;  %v1114_v28 = vadd.f32 %v1980_v63, %v1113_v22 }
 0x41d   :  { %1983 = vtanh.f32 %v2306_v24  ;;  %v1118_v32 = vsel %vm1117_vm11, %v1980_v63, %v1114_v28  ;;  %v1293_v28 = vrot.slane %v2306_v24, 7 }
 0x41e   :  { %v1123_v35 = vsel %vm1120_vm12, %v1122_v33, %v1118_v32 }
 0x423   :  { %v1984_v34 = vpop.eup %1983 }
 0x424   :  { %v1133_v37 = vmul.f32 %v1984_v34, %v1123_v35 }
 0x426   :  { %v1135_v38 = vrot.slane %v1133_v37, 5 }
 0x428   :  { %1856 = vmatmul.msk.f32.vlgmr.msrb.gmra.mxu0 %vm154_vm13, %v1135_v38  ;;  %1857 = vmatmul.msk.f32.vlgmr.msrb.gmra.mxu1 %vm154_vm13, %v1135_v38 }
 0x429   :  { %1858 = vmatmul.msk.f32.vlgmr.msrb.gmra.mxu2 %vm154_vm13, %v1135_v38  ;;  %1859 = vmatmul.msk.f32.vlgmr.msrb.gmra.mxu3 %vm154_vm13, %v1135_v38 }
 0x42a   :  { %1484 = vmatpush.msrb.mxu0 %v2313_v39  ;;  %1504 = vmatpush.msrb.mxu1 %v2316_v5 }
 0x42b   :  { %1524 = vmatpush.msrb.mxu2 %v2319_v6  ;;  %1544 = vmatpush.msrb.mxu3 %v2322_v41 }
 0x42c   :  { %1485 = vmatpush.msrb.mxu0 %v2325_v7  ;;  %1505 = vmatpush.msrb.mxu1 %v2328_v10 }
 0x42d   :  { %1525 = vmatpush.msrb.mxu2 %v2331_v8  ;;  %1545 = vmatpush.msrb.mxu3 %v2334_v9 }
 0x4a5   :  { %v1155_v43 = vpop.f32.mrf.mxu0  ;;  %v1175_v11 = vpop.f32.mrf.mxu1 }
 0x4a6   :  { %v1222_v44 = vrot.slane %v1155_v43, 2  ;;  %v1223_v12 = vrot.slane %v1175_v11, 2 }
 0x4a8   :  { %v1230_v26 = vadd.f32 %v1222_v44, %v2190_v27  ;;  %v1231_v45 = vadd.f32 %v1223_v12, %v2192_v29 }
 0x4aa   :  { %v1860_v46 = vmul.f32 -1.442695, %v1230_v26  ;;  %v1861_v47 = vmul.f32 -1.442695, %v1231_v45 }
 0x4ac   :  { %1985 = vpow2.f32 %v1860_v46  ;;  %v1195_v49 = vpop.f32.mrf.mxu2  ;;  %v1215_v57 = vpop.f32.mrf.mxu3 }
 0x4ad   :  { %1987 = vpow2.f32 %v1861_v47  ;;  %v1224_v50 = vrot.slane %v1195_v49, 2  ;;  %v1225_v58 = vrot.slane %v1215_v57, 2 }
 0x4af   :  { %v1232_v51 = vadd.f32 %v1224_v50, %v2200_v40  ;;  %v1233_v62 = vadd.f32 %v1225_v58, %v2203_v48 }
 0x4b1   :  { %v1862_v52 = vmul.f32 -1.442695, %v1232_v51 }
 0x4b2   :  { %v1986_v53 = vpop.eup %1985 }
 0x4b3   :  { %v1988_v55 = vpop.eup %1987  ;;  %v1243_v56 = vadd.f32 1.0, %v1986_v53  ;;  %1989 = vpow2.f32 %v1862_v52 }
 0x4b4   :  { %v1244_v42 = vadd.f32 1.0, %v1988_v55 }
 0x4b5   :  { %1991 = vrcp.f32 %v1243_v56  ;;  %v1257_v4 = vand.u32 2147483648, %v1243_v56  ;;  %v1255_v15 = vand.u32 2147483647, %v1243_v56  ;;  %vm1251_vm0 = vweird.f32 %v1243_v56 }
 0x4b6   :  { %1993 = vrcp.f32 %v1244_v42  ;;  %v1272_v13 = vand.u32 2147483648, %v1244_v42  ;;  %v1270_v17 = vand.u32 2147483647, %v1244_v42  ;;  %vm1266_vm1 = vweird.f32 %v1244_v42 }
 0x4b7   :  { %v1258_v22 = vor.u32 1.1754944e-38, %v1257_v4  ;;  %vm1256_vm4 = vcmp.eq.f32.partialorder %v1255_v15, 8.507059e+37 }
 0x4b8   :  { %v1273_v30 = vor.u32 1.1754944e-38, %v1272_v13  ;;  %vm1271_vm5 = vcmp.eq.f32.partialorder %v1270_v17, 8.507059e+37 }
 0x4b9   :  { %v1990_v59 = vpop.eup %1989 }
 0x4ba   :  { %v1245_v60 = vadd.f32 1.0, %v1990_v59 }
 0x4bb   :  { %v1992_v61 = vpop.eup %1991 }
 0x4bc   :  { %v1994_v63 = vpop.eup %1993  ;;  %v1247_v0 = vmul.f32 %v1992_v61, %v1243_v56  ;;  %1995 = vrcp.f32 %v1245_v60  ;;  %vm1252_vm14 = vweird.f32 %v1992_v61  ;;  %v1287_v26 = vand.u32 2147483648, %v1245_v60 }
 0x4bd   :  { %v1262_v2 = vmul.f32 %v1994_v63, %v1244_v42  ;;  %1997 = vtanh.f32 %v1233_v62  ;;  %vm1267_vm15 = vweird.f32 %v1994_v63  ;;  %vm1253_vm2 = vmor %vm1251_vm0, %vm1252_vm14  ;;  %vm1281_vm7 = vweird.f32 %v1245_v60 }
 0x4be   :  { %v1248_v3 = vsub.f32 1.0, %v1247_v0  ;;  %vm1268_vm3 = vmor %vm1266_vm1, %vm1267_vm15  ;;  %v1285_v24 = vand.u32 2147483647, %v1245_v60  ;;  %v1288_v46 = vor.u32 1.1754944e-38, %v1287_v26 }
 0x4bf   :  { %v1263_v54 = vsub.f32 1.0, %v1262_v2 }
 0x4c0   :  { %v1249_v14 = vmul.f32 %v1992_v61, %v1248_v3  ;;  %vm1286_vm9 = vcmp.eq.f32.partialorder %v1285_v24, 8.507059e+37 }
 0x4c1   :  { %v1264_v16 = vmul.f32 %v1994_v63, %v1263_v54 }
 0x4c2   :  { %v1996_v18 = vpop.eup %1995  ;;  %v1250_v19 = vadd.f32 %v1992_v61, %v1249_v14 }
 0x4c3   :  { %v1277_v21 = vmul.f32 %v1996_v18, %v1245_v60  ;;  %v1265_v1 = vadd.f32 %v1994_v63, %v1264_v16  ;;  %v1998_v32 = vpop.eup %1997  ;;  %vm1282_vm6 = vweird.f32 %v1996_v18 }
 0x4c4   :  { %v1254_v20 = vsel %vm1253_vm2, %v1992_v61, %v1250_v19  ;;  %vm1283_vm8 = vmor %vm1281_vm7, %vm1282_vm6 }
 0x4c5   :  { %v1278_v33 = vsub.f32 1.0, %v1277_v21  ;;  %v1259_v34 = vsel %vm1256_vm4, %v1258_v22, %v1254_v20  ;;  %v1269_v35 = vsel %vm1268_vm3, %v1994_v63, %v1265_v1 }
 0x4c6   :  { %v1274_v37 = vsel %vm1271_vm5, %v1273_v30, %v1269_v35  ;;  %v1296_v38 = vmul.f32 %v1998_v32, %v1259_v34 }
 0x4c7   :  { %v1279_v43 = vmul.f32 %v1996_v18, %v1278_v33  ;;  %v1295_v11 = vmul.f32 %v1293_v28, %v1274_v37 }
 0x4c9   :  { %v2342_v44 = vadd.f32 %v1296_v38, %v1295_v11  ;;  %v1280_v12 = vadd.f32 %v1996_v18, %v1279_v43 }
 0x4cb   :  { %1999 = vtanh.f32 %v2342_v44  ;;  %v1284_v45 = vsel %vm1283_vm8, %v1996_v18, %v1280_v12  ;;  %v1459_v1 = vrot.slane %v2342_v44, 7 }
 0x4cc   :  { %v1289_v49 = vsel %vm1286_vm9, %v1288_v46, %v1284_v45 }
 0x4d1   :  { %v2000_v47 = vpop.eup %1999 }
 0x4d2   :  { %v1299_v50 = vmul.f32 %v2000_v47, %v1289_v49 }
 0x4d4   :  { %v1301_v51 = vrot.slane %v1299_v50, 6 }
 0x4d6   :  { %1863 = vmatmul.msk.f32.vlgmr.msra.gmra.mxu0 %vm154_vm13, %v1301_v51  ;;  %1864 = vmatmul.msk.f32.vlgmr.msra.gmra.mxu1 %vm154_vm13, %v1301_v51 }
 0x4d7   :  { %1865 = vmatmul.msk.f32.vlgmr.msra.gmra.mxu2 %vm154_vm13, %v1301_v51  ;;  %1866 = vmatmul.msk.f32.vlgmr.msra.gmra.mxu3 %vm154_vm13, %v1301_v51 }
 0x4d8   :  { %1637 = vmatpush.msra.mxu0 %v2313_v39  ;;  %1657 = vmatpush.msra.mxu1 %v2316_v5 }
 0x4d9   :  { %1677 = vmatpush.msra.mxu2 %v2319_v6  ;;  %1697 = vmatpush.msra.mxu3 %v2322_v41 }
 0x4da   :  { %1638 = vmatpush.msra.mxu0 %v2325_v7  ;;  %1658 = vmatpush.msra.mxu1 %v2328_v10 }
 0x4db   :  { %1678 = vmatpush.msra.mxu2 %v2331_v8  ;;  %1698 = vmatpush.msra.mxu3 %v2334_v9 }
 0x553   :  { %v1321_v52 = vpop.f32.mrf.mxu0  ;;  %v1341_v53 = vpop.f32.mrf.mxu1 }
 0x554   :  { %v1388_v55 = vrot.slane %v1321_v52, 1  ;;  %v1389_v56 = vrot.slane %v1341_v53, 1 }
 0x556   :  { %v1396_v39 = vadd.f32 %v1388_v55, %v2190_v27  ;;  %v1397_v5 = vadd.f32 %v1389_v56, %v2192_v29 }
 0x558   :  { %v1867_v42 = vmul.f32 -1.442695, %v1396_v39  ;;  %v1868_v6 = vmul.f32 -1.442695, %v1397_v5 }
 0x55a   :  { %2001 = vpow2.f32 %v1867_v42  ;;  %v1361_v41 = vpop.f32.mrf.mxu2  ;;  %v1381_v60 = vpop.f32.mrf.mxu3 }
 0x55b   :  { %2003 = vpow2.f32 %v1868_v6  ;;  %v1390_v7 = vrot.slane %v1361_v41, 1  ;;  %v1391_v27 = vrot.slane %v1381_v60, 1 }
 0x55d   :  { %v1398_v10 = vadd.f32 %v1390_v7, %v2200_v40  ;;  %v1399_v63 = vadd.f32 %v1391_v27, %v2203_v48 }
 0x55f   :  { %v1869_v57 = vmul.f32 -1.442695, %v1398_v10 }
 0x560   :  { %v2002_v8 = vpop.eup %2001 }
 0x561   :  { %v2004_v58 = vpop.eup %2003  ;;  %v1409_v9 = vadd.f32 1.0, %v2002_v8  ;;  %2005 = vpow2.f32 %v1869_v57 }
 0x562   :  { %v1410_v59 = vadd.f32 1.0, %v2004_v58 }
 0x563   :  { %2007 = vrcp.f32 %v1409_v9  ;;  %v1423_v4 = vand.u32 2147483648, %v1409_v9  ;;  %v1421_v15 = vand.u32 2147483647, %v1409_v9  ;;  %vm1417_vm12 = vweird.f32 %v1409_v9 }
 0x564   :  { %2009 = vrcp.f32 %v1410_v59  ;;  %v1438_v13 = vand.u32 2147483648, %v1410_v59  ;;  %v1436_v17 = vand.u32 2147483647, %v1410_v59  ;;  %vm1432_vm14 = vweird.f32 %v1410_v59 }
 0x565   :  { %v1424_v21 = vor.u32 1.1754944e-38, %v1423_v4  ;;  %vm1422_vm1 = vcmp.eq.f32.partialorder %v1421_v15, 8.507059e+37 }
 0x566   :  { %v1439_v28 = vor.u32 1.1754944e-38, %v1438_v13  ;;  %vm1437_vm2 = vcmp.eq.f32.partialorder %v1436_v17, 8.507059e+37 }
 0x567   :  { %v2006_v61 = vpop.eup %2005 }
 0x568   :  { %v1411_v29 = vadd.f32 1.0, %v2006_v61 }
 0x569   :  { %v2008_v62 = vpop.eup %2007 }
 0x56a   :  { %v2010_v0 = vpop.eup %2009  ;;  %v1413_v2 = vmul.f32 %v2008_v62, %v1409_v9  ;;  %2011 = vrcp.f32 %v1411_v29  ;;  %vm1418_vm10 = vweird.f32 %v2008_v62  ;;  %v1453_v26 = vand.u32 2147483648, %v1411_v29 }
 0x56b   :  { %v1428_v3 = vmul.f32 %v2010_v0, %v1410_v59  ;;  %2013 = vtanh.f32 %v1399_v63  ;;  %vm1433_vm11 = vweird.f32 %v2010_v0  ;;  %vm1419_vm15 = vmor %vm1417_vm12, %vm1418_vm10  ;;  %vm1447_vm4 = vweird.f32 %v1411_v29 }
 0x56c   :  { %v1414_v40 = vsub.f32 1.0, %v1413_v2  ;;  %vm1434_vm0 = vmor %vm1432_vm14, %vm1433_vm11  ;;  %v1451_v44 = vand.u32 2147483647, %v1411_v29  ;;  %v1454_v45 = vor.u32 1.1754944e-38, %v1453_v26 }
 0x56d   :  { %v1429_v54 = vsub.f32 1.0, %v1428_v3 }
 0x56e   :  { %v1415_v14 = vmul.f32 %v2008_v62, %v1414_v40  ;;  %vm1452_vm6 = vcmp.eq.f32.partialorder %v1451_v44, 8.507059e+37 }
 0x56f   :  { %v1430_v16 = vmul.f32 %v2010_v0, %v1429_v54 }
 0x570   :  { %v2012_v18 = vpop.eup %2011  ;;  %v1416_v19 = vadd.f32 %v2008_v62, %v1415_v14 }
 0x571   :  { %v1443_v48 = vmul.f32 %v2012_v18, %v1411_v29  ;;  %v1431_v22 = vadd.f32 %v2010_v0, %v1430_v16  ;;  %v2014_v20 = vpop.eup %2013  ;;  %vm1448_vm3 = vweird.f32 %v2012_v18 }
 0x572   :  { %v1420_v30 = vsel %vm1419_vm15, %v2008_v62, %v1416_v19  ;;  %vm1449_vm5 = vmor %vm1447_vm4, %vm1448_vm3 }
 0x573   :  { %v1444_v32 = vsub.f32 1.0, %v1443_v48  ;;  %v1425_v33 = vsel %vm1422_vm1, %v1424_v21, %v1420_v30  ;;  %v1435_v34 = vsel %vm1434_vm0, %v2010_v0, %v1431_v22 }
 0x574   :  { %v1440_v35 = vsel %vm1437_vm2, %v1439_v28, %v1435_v34  ;;  %v1462_v37 = vmul.f32 %v2014_v20, %v1425_v33 }
 0x575   :  { %v1445_v38 = vmul.f32 %v2012_v18, %v1444_v32  ;;  %v1461_v43 = vmul.f32 %v1459_v1, %v1440_v35 }
 0x577   :  { %v2362_v11 = vadd.f32 %v1462_v37, %v1461_v43  ;;  %v1446_v12 = vadd.f32 %v2012_v18, %v1445_v38 }
 0x579   :  { %2015 = vtanh.f32 %v2362_v11  ;;  %v1450_v24 = vsel %vm1449_vm5, %v2012_v18, %v1446_v12  ;;  %v1613_v48 = vrot.slane %v2362_v11, 7 }
 0x57a   :  { %v1455_v47 = vsel %vm1452_vm6, %v1454_v45, %v1450_v24 }
 0x57f   :  { %v2016_v46 = vpop.eup %2015 }
 0x580   :  { %v1465_v49 = vmul.f32 %v2016_v46, %v1455_v47 }
 0x582   :  { %v1467_v50 = vrot.slane %v1465_v49, 7 }
 0x584   :  { %1870 = vmatmul.msk.f32.vlgmr.msrb.gmra.mxu0 %vm154_vm13, %v1467_v50  ;;  %1871 = vmatmul.msk.f32.vlgmr.msrb.gmra.mxu1 %vm154_vm13, %v1467_v50 }
 0x585   :  { %1872 = vmatmul.msk.f32.vlgmr.msrb.gmra.mxu2 %vm154_vm13, %v1467_v50  ;;  %1873 = vmatmul.msk.f32.vlgmr.msrb.gmra.mxu3 %vm154_vm13, %v1467_v50 }
 0x601   :  { %v1487_v51 = vpop.f32.mrf.mxu0  ;;  %v1507_v52 = vpop.f32.mrf.mxu1 }
 0x602   :  { %v1550_v53 = vadd.f32 %v1487_v51, %v2186_v23  ;;  %v1551_v55 = vadd.f32 %v1507_v52, %v2188_v25 }
 0x604   :  { %v1874_v56 = vmul.f32 -1.442695, %v1550_v53  ;;  %v1875_v39 = vmul.f32 -1.442695, %v1551_v55 }
 0x606   :  { %2017 = vpow2.f32 %v1874_v56 }
 0x607   :  { %2019 = vpow2.f32 %v1875_v39 }
 0x608   :  { %v1527_v5 = vpop.f32.mrf.mxu2  ;;  %v1547_v8 = vpop.f32.mrf.mxu3 }
 0x609   :  { %v1552_v42 = vadd.f32 %v1527_v5, %v2194_v31  ;;  %v1553_v60 = vadd.f32 %v1547_v8, %v2197_v36 }
 0x60b   :  { %v1876_v6 = vmul.f32 -1.442695, %v1552_v42 }
 0x60c   :  { %v2018_v41 = vpop.eup %2017 }
 0x60d   :  { %v2020_v7 = vpop.eup %2019  ;;  %v1563_v10 = vadd.f32 1.0, %v2018_v41  ;;  %2021 = vpow2.f32 %v1876_v6 }
 0x60e   :  { %v1564_v57 = vadd.f32 1.0, %v2020_v7 }
 0x60f   :  { %2023 = vrcp.f32 %v1563_v10  ;;  %v1577_v0 = vand.u32 2147483648, %v1563_v10  ;;  %v1575_v40 = vand.u32 2147483647, %v1563_v10  ;;  %vm1571_vm9 = vweird.f32 %v1563_v10 }
 0x610   :  { %2025 = vrcp.f32 %v1564_v57  ;;  %v1592_v2 = vand.u32 2147483648, %v1564_v57  ;;  %v1590_v4 = vand.u32 2147483647, %v1564_v57  ;;  %vm1586_vm10 = vweird.f32 %v1564_v57 }
 0x611   :  { %v1578_v16 = vor.u32 1.1754944e-38, %v1577_v0  ;;  %vm1576_vm14 = vcmp.eq.f32.partialorder %v1575_v40, 8.507059e+37 }
 0x612   :  { %v1593_v18 = vor.u32 1.1754944e-38, %v1592_v2  ;;  %vm1591_vm15 = vcmp.eq.f32.partialorder %v1590_v4, 8.507059e+37 }
 0x613   :  { %v2022_v58 = vpop.eup %2021 }
 0x614   :  { %v1565_v9 = vadd.f32 1.0, %v2022_v58 }
 0x615   :  { %v2024_v59 = vpop.eup %2023 }
 0x616   :  { %v2026_v27 = vpop.eup %2025  ;;  %v1567_v61 = vmul.f32 %v2024_v59, %v1563_v10  ;;  %2027 = vrcp.f32 %v1565_v9  ;;  %vm1572_vm7 = vweird.f32 %v2024_v59  ;;  %v1607_v37 = vand.u32 2147483648, %v1565_v9 }
 0x617   :  { %v1582_v29 = vmul.f32 %v2026_v27, %v1564_v57  ;;  %2029 = vtanh.f32 %v1553_v60  ;;  %vm1587_vm8 = vweird.f32 %v2026_v27  ;;  %vm1573_vm11 = vmor %vm1571_vm9, %vm1572_vm7  ;;  %vm1601_vm1 = vweird.f32 %v1565_v9 }
 0x618   :  { %v1568_v62 = vsub.f32 1.0, %v1567_v61  ;;  %vm1588_vm12 = vmor %vm1586_vm10, %vm1587_vm8  ;;  %v1605_v38 = vand.u32 2147483647, %v1565_v9  ;;  %v1608_v11 = vor.u32 1.1754944e-38, %v1607_v37 }
 0x619   :  { %v1583_v63 = vsub.f32 1.0, %v1582_v29 }
 0x61a   :  { %v1569_v3 = vmul.f32 %v2024_v59, %v1568_v62  ;;  %vm1606_vm3 = vcmp.eq.f32.partialorder %v1605_v38, 8.507059e+37 }
 0x61b   :  { %v1584_v54 = vmul.f32 %v2026_v27, %v1583_v63 }
 0x61c   :  { %v2028_v13 = vpop.eup %2027  ;;  %v1570_v14 = vadd.f32 %v2024_v59, %v1569_v3 }
 0x61d   :  { %v1597_v15 = vmul.f32 %v2028_v13, %v1565_v9  ;;  %v1585_v17 = vadd.f32 %v2026_v27, %v1584_v54  ;;  %v2030_v21 = vpop.eup %2029  ;;  %vm1602_vm0 = vweird.f32 %v2028_v13 }
 0x61e   :  { %v1574_v19 = vsel %vm1573_vm11, %v2024_v59, %v1570_v14  ;;  %vm1603_vm2 = vmor %vm1601_vm1, %vm1602_vm0  ;;  %vm1786_vm0 = vcmask 1041409   ;;  %vm1791_vm1 = vcmask 1025  }
 0x61f   :  { %v1598_v22 = vsub.f32 1.0, %v1597_v15  ;;  %v1579_v1 = vsel %vm1576_vm14, %v1578_v16, %v1574_v19  ;;  %v1589_v28 = vsel %vm1588_vm12, %v2026_v27, %v1585_v17 }
 0x620   :  { %v1594_v30 = vsel %vm1591_vm15, %v1593_v18, %v1589_v28  ;;  %v1616_v20 = vmul.f32 %v2030_v21, %v1579_v1 }
 0x621   :  { %v1599_v32 = vmul.f32 %v2028_v13, %v1598_v22  ;;  %v1615_v33 = vmul.f32 %v1613_v48, %v1594_v30 }
 0x623   :  { %v2374_v34 = vadd.f32 %v1616_v20, %v1615_v33  ;;  %v1600_v35 = vadd.f32 %v2028_v13, %v1599_v32 }
 0x625   :  { %2031 = vtanh.f32 %v2374_v34  ;;  %v1604_v43 = vsel %vm1603_vm2, %v2028_v13, %v1600_v35  ;;  %v1778_v4 = vrot.slane %v2374_v34, 7  ;;  %v42_v35 = vld [vmem:[#allocation2 + $0x61] ss:$0 sm:$0xff] }
 0x626   :  { %v1609_v26 = vsel %vm1606_vm3, %v1608_v11, %v1604_v43 }
 0x62b   :  { %v2032_v12 = vpop.eup %2031 }
 0x62c   :  { %v1619_v44 = vmul.f32 %v2032_v12, %v1609_v26  ;;  %v43_v12 = vld [vmem:[#allocation2 + $0x62] ss:$0 sm:$0xff] }
 0x62e   :  { %1877 = vmatmul.msk.f32.vlgmr.msra.gmra.mxu0 %vm154_vm13, %v1619_v44  ;;  %1878 = vmatmul.msk.f32.vlgmr.msra.gmra.mxu1 %vm154_vm13, %v1619_v44 }
 0x62f   :  { %1879 = vmatmul.msk.f32.vlgmr.msra.gmra.mxu2 %vm154_vm13, %v1619_v44  ;;  %1880 = vmatmul.msk.f32.vlgmr.msra.gmra.mxu3 %vm154_vm13, %v1619_v44 }
 0x6ab   :  { %v1640_v24 = vpop.f32.mrf.mxu0  ;;  %v1660_v45 = vpop.f32.mrf.mxu1 }
 0x6ac   :  { %v1707_v46 = vrot.slane %v1640_v24, 7  ;;  %v1708_v47 = vrot.slane %v1660_v45, 7 }
 0x6ae   :  { %v1715_v49 = vadd.f32 %v1707_v46, %v2186_v23  ;;  %v1716_v50 = vadd.f32 %v1708_v47, %v2188_v25 }
 0x6b0   :  { %v1881_v51 = vmul.f32 -1.442695, %v1715_v49  ;;  %v1882_v52 = vmul.f32 -1.442695, %v1716_v50 }
 0x6b2   :  { %2033 = vpow2.f32 %v1881_v51  ;;  %v1680_v53 = vpop.f32.mrf.mxu2  ;;  %v1700_v7 = vpop.f32.mrf.mxu3 }
 0x6b3   :  { %2035 = vpow2.f32 %v1882_v52  ;;  %v1709_v55 = vrot.slane %v1680_v53, 7  ;;  %v1710_v23 = vrot.slane %v1700_v7, 7 }
 0x6b5   :  { %v1717_v56 = vadd.f32 %v1709_v55, %v2194_v31  ;;  %v1718_v8 = vadd.f32 %v1710_v23, %v2197_v36 }
 0x6b7   :  { %v1883_v39 = vmul.f32 -1.442695, %v1717_v56 }
 0x6b8   :  { %v2034_v5 = vpop.eup %2033 }
 0x6b9   :  { %v2036_v42 = vpop.eup %2035  ;;  %v1728_v6 = vadd.f32 1.0, %v2034_v5  ;;  %2037 = vpow2.f32 %v1883_v39 }
 0x6ba   :  { %v1729_v41 = vadd.f32 1.0, %v2036_v42 }
 0x6bb   :  { %2039 = vrcp.f32 %v1728_v6  ;;  %v1742_v27 = vand.u32 2147483648, %v1728_v6  ;;  %v1740_v62 = vand.u32 2147483647, %v1728_v6  ;;  %vm1736_vm5 = vweird.f32 %v1728_v6 }
 0x6bc   :  { %2041 = vrcp.f32 %v1729_v41  ;;  %v1757_v61 = vand.u32 2147483648, %v1729_v41  ;;  %v1755_v0 = vand.u32 2147483647, %v1729_v41  ;;  %vm1751_vm6 = vweird.f32 %v1729_v41 }
 0x6bd   :  { %v1743_v36 = vor.u32 1.1754944e-38, %v1742_v27  ;;  %vm1741_vm9 = vcmp.eq.f32.partialorder %v1740_v62, 8.507059e+37 }
 0x6be   :  { %v1758_v13 = vor.u32 1.1754944e-38, %v1757_v61  ;;  %vm1756_vm10 = vcmp.eq.f32.partialorder %v1755_v0, 8.507059e+37 }
 0x6bf   :  { %v2038_v10 = vpop.eup %2037 }
 0x6c0   :  { %v1730_v25 = vadd.f32 1.0, %v2038_v10 }
 0x6c1   :  { %v2040_v57 = vpop.eup %2039 }
 0x6c2   :  { %v2042_v58 = vpop.eup %2041  ;;  %v1732_v9 = vmul.f32 %v2040_v57, %v1728_v6  ;;  %2043 = vrcp.f32 %v1730_v25  ;;  %vm1737_vm13 = vweird.f32 %v2040_v57  ;;  %v1772_v30 = vand.u32 2147483648, %v1730_v25 }
 0x6c3   :  { %v1747_v59 = vmul.f32 %v2042_v58, %v1729_v41  ;;  %2045 = vtanh.f32 %v1718_v8  ;;  %vm1752_vm4 = vweird.f32 %v2042_v58  ;;  %vm1738_vm7 = vmor %vm1736_vm5, %vm1737_vm13  ;;  %vm1766_vm12 = vweird.f32 %v1730_v25 }
 0x6c4   :  { %v1733_v31 = vsub.f32 1.0, %v1732_v9  ;;  %vm1753_vm8 = vmor %vm1751_vm6, %vm1752_vm4  ;;  %v1770_v20 = vand.u32 2147483647, %v1730_v25  ;;  %v1773_v33 = vor.u32 1.1754944e-38, %v1772_v30 }
 0x6c5   :  { %v1748_v60 = vsub.f32 1.0, %v1747_v59 }
 0x6c6   :  { %v1734_v29 = vmul.f32 %v2040_v57, %v1733_v31  ;;  %vm1771_vm15 = vcmp.eq.f32.partialorder %v1770_v20, 8.507059e+37 }
 0x6c7   :  { %v1749_v63 = vmul.f32 %v2042_v58, %v1748_v60 }
 0x6c8   :  { %v2044_v2 = vpop.eup %2043  ;;  %v1735_v3 = vadd.f32 %v2040_v57, %v1734_v29 }
 0x6c9   :  { %v1750_v40 = vadd.f32 %v2042_v58, %v1749_v63  ;;  %v1762_v54 = vmul.f32 %v2044_v2, %v1730_v25  ;;  %v2046_v15 = vpop.eup %2045  ;;  %vm1767_vm11 = vweird.f32 %v2044_v2 }
 0x6ca   :  { %v1739_v14 = vsel %vm1738_vm7, %v2040_v57, %v1735_v3  ;;  %vm1768_vm14 = vmor %vm1766_vm12, %vm1767_vm11 }
 0x6cb   :  { %v1744_v16 = vsel %vm1741_vm9, %v1743_v36, %v1739_v14  ;;  %v1754_v17 = vsel %vm1753_vm8, %v2042_v58, %v1750_v40  ;;  %v1763_v18 = vsub.f32 1.0, %v1762_v54 }
 0x6cc   :  { %v1781_v19 = vmul.f32 %v2046_v15, %v1744_v16  ;;  %v1759_v48 = vsel %vm1756_vm10, %v1758_v13, %v1754_v17 }
 0x6cd   :  { %v1764_v21 = vmul.f32 %v2044_v2, %v1763_v18  ;;  %v1780_v22 = vmul.f32 %v1778_v4, %v1759_v48 }
 0x6cf   :  { %v1782_v1 = vadd.f32 %v1781_v19, %v1780_v22  ;;  %v1765_v28 = vadd.f32 %v2044_v2, %v1764_v21 }
 0x6d1   :  { %2047 = vtanh.f32 %v1782_v1  ;;  %v1769_v32 = vsel %vm1768_vm14, %v2044_v2, %v1765_v28 }
 0x6d2   :  { %v1774_v37 = vsel %vm1771_vm15, %v1773_v33, %v1769_v32 }
 0x6d7   :  { %v2048_v34 = vpop.eup %2047 }
 0x6d8   :  { %v1784_v38 = vmul.f32 %v2048_v34, %v1774_v37 }
 0x6da   :  { %v1785_v43 = vmul.f32 %v1784_v38, %v42_v35 }
 0x6dc   :  { %v1787_v11 = vsel %vm1786_vm0, %v1785_v43, 0.0 }
 0x6dd   :  { %1788 = vadd.xlane.f32.xlu0 %v1787_v11 }
 0x750   :  { %v1789_v26 = vpop.xlane.xlu0 %1788 }
 0x751   :  { %v1790_v44 = vadd.f32 %v1789_v26, %v43_v12 }
 0x753   :  { %1792 = vst.msk [vmem:[#allocation5 - $0x1] sm:$0x2] %vm1791_vm1, %v1790_v44 }
 0x754   :  { %1803 = dma.vmem_to_hbm [thread:$0]  %s1799_s19, 16, %s1801_s22, [#allocation4]  }
 0x755   :  { %2107 = dma.done.wait [#allocation4], 16  }
 0x756   :  { %2108 = vsyncadd [#allocation4], 4294967280 }
 0x757   :  { %1808 = vsyncpa [#allocation3], 1 }
 0x758   :  { %1809 = vsyncpa [#allocation4], 1 }

</bundles_post_ra>
